<compile_context>
chip_gen: v7x
topology: tpu7x:2x2x1
jax: 0.10.0
libtpu: 0.0.40
codegen_flags: <defaults>
</compile_context>

<pallas_src>
import jax
import jax.numpy as jnp
from jax.experimental import pallas as pl
from jax.experimental.pallas import tpu as pltpu


def din_kernel(cand_ref, seq_ref, mask_ref,
               w1c_ref, w1s_ref, b1_ref, w2_ref, b2_ref,
               out_ref):
    # cand_ref : (TB, Di+Dc)      fused candidate [item | cat] embedding
    # seq_ref  : (TB, S, Dseq)    fused sequence slab [items|cats|times|beh]
    # mask_ref : (TB, S)          f32 mask
    # w1c_ref  : (Di+Dc, H)       w1 rows for the candidate segments
    # w1s_ref  : (Dseq,  H)       w1 rows for the sequence segments
    # b1_ref   : (1, H)           f32
    # w2_ref   : (1, H)           f32 (second Linear as a row)
    # b2_ref   : (1,) in SMEM     f32 scalar
    # out_ref  : (TB, Di+Dc)      pooled short-term interest
    TB, S, Dseq = seq_ref.shape
    H = b1_ref.shape[-1]
    Do = out_ref.shape[-1]
    f32 = jnp.float32

    # ---- attention MLP, layer 1 --------------------------------------------
    # Candidate contribution: one (TB, Dcand) x (Dcand, H) matmul, broadcast
    # over the sequence axis (never duplicated per position).
    cand_h = jnp.dot(cand_ref[...], w1c_ref[...], preferred_element_type=f32)
    cand_h = cand_h + b1_ref[...]                                  # (TB, H)

    # Sequence contribution: a single (TB*S, Dseq) x (Dseq, H) matmul.
    seq2 = seq_ref[...].reshape(TB * S, Dseq)
    h = jnp.dot(seq2, w1s_ref[...], preferred_element_type=f32)    # (TB*S, H)
    h = h.reshape(TB, S, H) + cand_h[:, None, :]                   # (TB, S, H)

    # SiLU
    h = h * jax.nn.sigmoid(h)

    # ---- layer 2 (H -> 1) as a lane reduction ------------------------------
    logits = jnp.sum(h * w2_ref[...], axis=-1, keepdims=True)      # (TB, S, 1)
    logits = logits + b2_ref[0]
    score = jax.nn.sigmoid(logits) * mask_ref[...][:, :, None]     # (TB, S, 1)

    # normalize over the sequence axis
    denom = jnp.sum(score, axis=1, keepdims=True) + 1e-8           # (TB, 1, 1)
    r = pl.reciprocal(denom, approx=True)
    r = r * (2.0 - denom * r)            # one Newton step -> ~f32 accuracy
    score = score * r                                              # (TB, S, 1)

    # ---- weighted pooling: slab is ordered [items | cats | ...], so the
    # pooled output is simply the first Do lanes of the weighted sum.
    pooled = jnp.sum(seq_ref[...].astype(f32) * score, axis=1)     # (TB, Dseq)
    out_ref[...] = pooled[:, :Do]


def din_forward(item_emb, cat_emb, seq_items_emb, seq_cats_emb,
                seq_times_emb, seq_behaviors_emb, mask, params,
                *, block_b=512, stream_dtype=jnp.float32,
                vmem_limit_bytes=48 * 1024 * 1024):
    """DIN forward.  Weight row-splitting / feature fusion / padding happen in
    plain JAX; the attention MLP, masking, normalization and pooling run in a
    single Pallas kernel processing `block_b` batch rows per grid step."""
    w1, b1, w2, b2 = params
    B, S, Di = seq_items_emb.shape
    Dc = seq_cats_emb.shape[-1]
    Dt = seq_times_emb.shape[-1]
    Db = seq_behaviors_emb.shape[-1]
    H = w1.shape[-1]
    Do = Di + Dc
    Dcand = Di + Dc
    Dseq = Di + Dc + Dt + Db

    sd = stream_dtype
    f32 = jnp.float32

    # Split w1's rows per feature segment (torch concat order:
    # [cand_item, seq_item, cand_cat, seq_cat, time, behavior]) and re-fuse
    # them into a candidate block and ONE fused sequence block so the
    # (B, S, F) concatenated slab is never materialized and the kernel does a
    # single K=Dseq MXU push per step.
    o1, o2 = Di, 2 * Di
    o3, o4 = 2 * Di + Dc, 2 * Di + 2 * Dc
    o5, o6 = 2 * Di + 2 * Dc + Dt, 2 * Di + 2 * Dc + Dt + Db
    w1_cand = jnp.concatenate([w1[0:o1], w1[o2:o3]], axis=0).astype(sd)
    w1_seq = jnp.concatenate([w1[o1:o2], w1[o3:o4], w1[o4:o5], w1[o5:o6]],
                             axis=0).astype(sd)

    # Fused lane-dense input slabs (these fuse with the stream-dtype cast).
    cand = jnp.concatenate([item_emb, cat_emb], axis=-1).astype(sd)   # (B, Dcand)
    seq = jnp.concatenate(
        [seq_items_emb, seq_cats_emb, seq_times_emb, seq_behaviors_emb],
        axis=-1).astype(sd)                                           # (B, S, Dseq)

    b1_2d = b1.reshape(1, H).astype(f32)
    w2_row = w2.reshape(1, H).astype(f32)
    b2_1d = b2.reshape(1).astype(f32)          # -> SMEM scalar
    mask2 = mask.astype(f32)                   # (B, S), no trailing singleton

    # ---- batch tiling --------------------------------------------------------
    TB = max(8, min(block_b, B))
    TB = ((TB + 7) // 8) * 8                   # sublane-align
    if TB >= B and B > 8:
        # Keep >= 2 grid steps so the parallel axis can shard across both
        # TensorCores on v7x (and pipelining has something to overlap).
        TB = (((B + 1) // 2) + 7) // 8 * 8
    Bp = pl.cdiv(B, TB) * TB
    if Bp != B:
        pad = Bp - B

        def padb(x):
            return jnp.pad(x, ((0, pad),) + ((0, 0),) * (x.ndim - 1))

        cand, seq, mask2 = padb(cand), padb(seq), padb(mask2)
        # Padded rows have mask == 0 -> score == 0 everywhere -> pooled == 0.

    row2 = lambda b: (b, 0)
    row3 = lambda b: (b, 0, 0)
    rep2 = lambda b: (0, 0)

    out = pl.pallas_call(
        din_kernel,
        out_shape=jax.ShapeDtypeStruct((Bp, Do), f32),
        grid_spec=pltpu.PrefetchScalarGridSpec(
            num_scalar_prefetch=0,
            grid=(Bp // TB,),
            in_specs=[
                pl.BlockSpec((TB, Dcand), row2),     # fused candidate emb
                pl.BlockSpec((TB, S, Dseq), row3),   # fused sequence slab
                pl.BlockSpec((TB, S), row2),         # mask (2-D, lane-denser)
                pl.BlockSpec((Dcand, H), rep2),      # w1 candidate rows
                pl.BlockSpec((Dseq, H), rep2),       # w1 sequence rows
                pl.BlockSpec((1, H), rep2),          # b1
                pl.BlockSpec((1, H), rep2),          # w2 (as a row)
                pl.BlockSpec(memory_space=pltpu.MemorySpace.SMEM),  # b2 scalar
            ],
            out_specs=pl.BlockSpec((TB, Do), row2),
        ),
        compiler_params=pltpu.CompilerParams(
            dimension_semantics=("parallel",),
            vmem_limit_bytes=vmem_limit_bytes),
    )(cand, seq, mask2, w1_cand, w1_seq, b1_2d, w2_row, b2_1d)

    return out[:B] if Bp != B else out


def din_reference(item_emb, cat_emb, seq_items_emb, seq_cats_emb,
                  seq_times_emb, seq_behaviors_emb, mask, params):
    """Pure-JAX reference mirroring the PyTorch forward."""
    w1, b1, w2, b2 = params
    B, S, _ = seq_items_emb.shape
    exp_item = jnp.broadcast_to(item_emb[:, None, :], (B, S, item_emb.shape[-1]))
    exp_cat = jnp.broadcast_to(cat_emb[:, None, :], (B, S, cat_emb.shape[-1]))
    feat = jnp.concatenate(
        [exp_item, seq_items_emb, exp_cat, seq_cats_emb,
         seq_times_emb, seq_behaviors_emb], axis=2)
    h = feat @ w1 + b1
    h = h * jax.nn.sigmoid(h)
    score = jax.nn.sigmoid(h @ w2 + b2)[..., 0] * mask
    score = score / (score.sum(axis=1, keepdims=True) + 1e-8)
    wi = (seq_items_emb * score[..., None]).sum(axis=1)
    wc = (seq_cats_emb * score[..., None]).sum(axis=1)
    return jnp.concatenate([wi, wc], axis=1)


if __name__ == "__main__":
    # Small deterministic example shapes.
    B = 64         # batch
    S = 8          # sequence length
    ITEM_D = 16    # item embedding dim
    CAT_D = 8      # category embedding dim
    TIME_D = 8     # time embedding dim
    BEH_D = 8      # behavior embedding dim
    HIDDEN = 32    # attention hidden size
    F = ITEM_D * 2 + CAT_D * 2 + TIME_D + BEH_D

    key = jax.random.PRNGKey(0)
    keys = jax.random.split(key, 11)

    item_emb = jax.random.normal(keys[0], (B, ITEM_D), jnp.float32)
    cat_emb = jax.random.normal(keys[1], (B, CAT_D), jnp.float32)
    seq_items_emb = jax.random.normal(keys[2], (B, S, ITEM_D), jnp.float32)
    seq_cats_emb = jax.random.normal(keys[3], (B, S, CAT_D), jnp.float32)
    seq_times_emb = jax.random.normal(keys[4], (B, S, TIME_D), jnp.float32)
    seq_behaviors_emb = jax.random.normal(keys[5], (B, S, BEH_D), jnp.float32)
    mask = (jax.random.uniform(keys[6], (B, S)) > 0.3).astype(jnp.float32)

    # Deterministic parameter init (mimics nn.Linear shapes).
    w1 = jax.random.normal(keys[7], (F, HIDDEN), jnp.float32) * 0.1
    b1 = jax.random.normal(keys[8], (HIDDEN,), jnp.float32) * 0.1
    w2 = jax.random.normal(keys[9], (HIDDEN, 1), jnp.float32) * 0.1
    b2 = jax.random.normal(keys[10], (1,), jnp.float32) * 0.1
    params = (w1, b1, w2, b2)

    ref = din_reference(item_emb, cat_emb, seq_items_emb, seq_cats_emb,
                        seq_times_emb, seq_behaviors_emb, mask, params)

    # Exact-semantics f32 path.
    out = din_forward(item_emb, cat_emb, seq_items_emb, seq_cats_emb,
                      seq_times_emb, seq_behaviors_emb, mask, params)
    out = jax.block_until_ready(out)
    assert out.shape == (B, ITEM_D + CAT_D)
    assert jnp.allclose(out, ref, rtol=1e-4, atol=1e-4)

    # bf16 streaming path (halves HBM traffic; looser tolerance since the
    # embeddings entering the pooling product are quantized).
    out_bf16 = din_forward(item_emb, cat_emb, seq_items_emb, seq_cats_emb,
                           seq_times_emb, seq_behaviors_emb, mask, params,
                           stream_dtype=jnp.bfloat16)
    out_bf16 = jax.block_until_ready(out_bf16)
    assert jnp.allclose(out_bf16, ref, rtol=5e-2, atol=5e-2)

    print("KERNEL_OK")
</pallas_src>

<mosaic_0001>
module attributes {stable_mosaic.version = 11 : i64} {
  func.func @din_kernel(%arg0: i32, %arg1: memref<32x24xf32, #tpu.memory_space<vmem>>, %arg2: memref<32x8x40xf32, #tpu.memory_space<vmem>>, %arg3: memref<32x8xf32, #tpu.memory_space<vmem>>, %arg4: memref<24x32xf32, #tpu.memory_space<vmem>>, %arg5: memref<40x32xf32, #tpu.memory_space<vmem>>, %arg6: memref<1x32xf32, #tpu.memory_space<vmem>>, %arg7: memref<1x32xf32, #tpu.memory_space<vmem>>, %arg8: memref<1xf32, #tpu.memory_space<smem>>, %arg9: memref<32x24xf32, #tpu.memory_space<vmem>>) attributes {dimension_semantics = [#tpu.dimension_semantics<parallel>], iteration_bounds = array<i64: 2>, scalar_prefetch = 0 : i64, scratch_operands = 0 : i64, tpu.core_type = #tpu.core_type<tc>, window_params = [{transform_indices = @transform_0, window_bounds = array<i64: 32, 24>}, {transform_indices = @transform_1, window_bounds = array<i64: 32, 8, 40>}, {transform_indices = @transform_2, window_bounds = array<i64: 32, 8>}, {pipeline_mode = #tpu.pipeline_mode<synchronous>, transform_indices = @transform_3, window_bounds = array<i64: 24, 32>}, {pipeline_mode = #tpu.pipeline_mode<synchronous>, transform_indices = @transform_4, window_bounds = array<i64: 40, 32>}, {pipeline_mode = #tpu.pipeline_mode<synchronous>, transform_indices = @transform_5, window_bounds = array<i64: 1, 32>}, {pipeline_mode = #tpu.pipeline_mode<synchronous>, transform_indices = @transform_6, window_bounds = array<i64: 1, 32>}, {transform_indices = @transform_7, window_bounds = array<i64: 1>}, {transform_indices = @transform_8, window_bounds = array<i64: 32, 24>}]} {
    %c0 = arith.constant 0 : index
    %c0_0 = arith.constant 0 : index
    %0 = vector.load %arg1[%c0, %c0_0] : memref<32x24xf32, #tpu.memory_space<vmem>>, vector<32x24xf32>
    %c0_1 = arith.constant 0 : index
    %c0_2 = arith.constant 0 : index
    %1 = vector.load %arg4[%c0_1, %c0_2] : memref<24x32xf32, #tpu.memory_space<vmem>>, vector<24x32xf32>
    %cst = arith.constant dense<0.000000e+00> : vector<32x32xf32>
    %2 = tpu.matmul %0, %1, %cst {dimension_numbers = #tpu.dot_dimension_numbers<[1], [0], [0], [1], [0, 0, 1, 1], [], []>} : vector<32x24xf32>, vector<24x32xf32>, vector<32x32xf32> -> vector<32x32xf32>
    %c0_3 = arith.constant 0 : index
    %c0_4 = arith.constant 0 : index
    %3 = vector.load %arg6[%c0_3, %c0_4] : memref<1x32xf32, #tpu.memory_space<vmem>>, vector<1x32xf32>
    %4 = vector.broadcast %3 : vector<1x32xf32> to vector<32x32xf32>
    %5 = arith.addf %2, %4 : vector<32x32xf32>
    %c0_5 = arith.constant 0 : index
    %c0_6 = arith.constant 0 : index
    %c0_7 = arith.constant 0 : index
    %6 = vector.load %arg2[%c0_5, %c0_6, %c0_7] : memref<32x8x40xf32, #tpu.memory_space<vmem>>, vector<32x8x40xf32>
    %7 = vector.shape_cast %6 : vector<32x8x40xf32> to vector<256x40xf32>
    %c0_8 = arith.constant 0 : index
    %c0_9 = arith.constant 0 : index
    %8 = vector.load %arg5[%c0_8, %c0_9] : memref<40x32xf32, #tpu.memory_space<vmem>>, vector<40x32xf32>
    %cst_10 = arith.constant dense<0.000000e+00> : vector<256x32xf32>
    %9 = tpu.matmul %7, %8, %cst_10 {dimension_numbers = #tpu.dot_dimension_numbers<[1], [0], [0], [1], [0, 0, 1, 1], [], []>} : vector<256x40xf32>, vector<40x32xf32>, vector<256x32xf32> -> vector<256x32xf32>
    %10 = vector.shape_cast %9 : vector<256x32xf32> to vector<32x8x32xf32>
    %11 = vector.shape_cast %5 : vector<32x32xf32> to vector<32x1x32xf32>
    %12 = vector.broadcast %11 : vector<32x1x32xf32> to vector<32x8x32xf32>
    %13 = arith.addf %10, %12 : vector<32x8x32xf32>
    %14 = arith.negf %13 : vector<32x8x32xf32>
    %15 = math.exp %14 : vector<32x8x32xf32>
    %cst_11 = arith.constant 1.000000e+00 : f32
    %16 = vector.broadcast %cst_11 : f32 to vector<32x8x32xf32>
    %17 = arith.addf %16, %15 : vector<32x8x32xf32>
    %18 = arith.divf %16, %17 : vector<32x8x32xf32>
    %19 = arith.mulf %13, %18 : vector<32x8x32xf32>
    %c0_12 = arith.constant 0 : index
    %c0_13 = arith.constant 0 : index
    %20 = vector.load %arg7[%c0_12, %c0_13] : memref<1x32xf32, #tpu.memory_space<vmem>>, vector<1x32xf32>
    %21 = vector.shape_cast %20 : vector<1x32xf32> to vector<1x1x32xf32>
    %22 = vector.broadcast %21 : vector<1x1x32xf32> to vector<32x8x32xf32>
    %23 = arith.mulf %19, %22 : vector<32x8x32xf32>
    %cst_14 = arith.constant dense<0.000000e+00> : vector<32x8xf32>
    %24 = vector.multi_reduction <add>, %23, %cst_14 [2] : vector<32x8x32xf32> to vector<32x8xf32>
    %25 = vector.shape_cast %24 : vector<32x8xf32> to vector<32x8x1xf32>
    %c0_15 = arith.constant 0 : index
    %26 = memref.load %arg8[%c0_15] : memref<1xf32, #tpu.memory_space<smem>>
    %27 = vector.broadcast %26 : f32 to vector<32x8x1xf32>
    %28 = arith.addf %25, %27 : vector<32x8x1xf32>
    %29 = arith.negf %28 : vector<32x8x1xf32>
    %30 = math.exp %29 : vector<32x8x1xf32>
    %cst_16 = arith.constant 1.000000e+00 : f32
    %31 = vector.broadcast %cst_16 : f32 to vector<32x8x1xf32>
    %32 = arith.addf %31, %30 : vector<32x8x1xf32>
    %33 = arith.divf %31, %32 : vector<32x8x1xf32>
    %c0_17 = arith.constant 0 : index
    %c0_18 = arith.constant 0 : index
    %34 = vector.load %arg3[%c0_17, %c0_18] : memref<32x8xf32, #tpu.memory_space<vmem>>, vector<32x8xf32>
    %35 = vector.shape_cast %34 : vector<32x8xf32> to vector<32x8x1xf32>
    %36 = arith.mulf %33, %35 : vector<32x8x1xf32>
    %cst_19 = arith.constant dense<0.000000e+00> : vector<32x1xf32>
    %37 = vector.multi_reduction <add>, %36, %cst_19 [1] : vector<32x8x1xf32> to vector<32x1xf32>
    %38 = vector.shape_cast %37 : vector<32x1xf32> to vector<32x1x1xf32>
    %cst_20 = arith.constant 9.99999993E-9 : f32
    %39 = vector.broadcast %cst_20 : f32 to vector<32x1x1xf32>
    %40 = arith.addf %38, %39 : vector<32x1x1xf32>
    %41 = tpu.reciprocal %40 {approx = true} : vector<32x1x1xf32> -> vector<32x1x1xf32>
    %42 = arith.mulf %40, %41 : vector<32x1x1xf32>
    %cst_21 = arith.constant 2.000000e+00 : f32
    %43 = vector.broadcast %cst_21 : f32 to vector<32x1x1xf32>
    %44 = arith.subf %43, %42 : vector<32x1x1xf32>
    %45 = arith.mulf %41, %44 : vector<32x1x1xf32>
    %46 = vector.broadcast %45 : vector<32x1x1xf32> to vector<32x8x1xf32>
    %47 = arith.mulf %36, %46 : vector<32x8x1xf32>
    %c0_22 = arith.constant 0 : index
    %c0_23 = arith.constant 0 : index
    %c0_24 = arith.constant 0 : index
    %48 = vector.load %arg2[%c0_22, %c0_23, %c0_24] : memref<32x8x40xf32, #tpu.memory_space<vmem>>, vector<32x8x40xf32>
    %49 = vector.broadcast %47 : vector<32x8x1xf32> to vector<32x8x40xf32>
    %50 = arith.mulf %48, %49 : vector<32x8x40xf32>
    %cst_25 = arith.constant dense<0.000000e+00> : vector<32x40xf32>
    %51 = vector.multi_reduction <add>, %50, %cst_25 [1] : vector<32x8x40xf32> to vector<32x40xf32>
    %52 = vector.extract_strided_slice %51 {offsets = [0, 0], sizes = [32, 24], strides = [1, 1]} : vector<32x40xf32> to vector<32x24xf32>
    %c0_26 = arith.constant 0 : index
    %c0_27 = arith.constant 0 : index
    %53 = vector.load %arg9[%c0_26, %c0_27] : memref<32x24xf32, #tpu.memory_space<vmem>>, vector<32x24xf32>
    tpu.vector_store %arg9[%c0_26, %c0_27], %52 {strides = array<i32>} : memref<32x24xf32, #tpu.memory_space<vmem>>, vector<32x24xf32>,
    return
  }
  func.func @transform_0(%arg0: i32) -> (i32, i32) {
    %c0_i32 = arith.constant 0 : i32
    %c0_i32_0 = arith.constant 0 : i32
    return %arg0, %c0_i32 : i32, i32
  }
  func.func @transform_1(%arg0: i32) -> (i32, i32, i32) {
    %c0_i32 = arith.constant 0 : i32
    %c0_i32_0 = arith.constant 0 : i32
    %c0_i32_1 = arith.constant 0 : i32
    return %arg0, %c0_i32, %c0_i32_0 : i32, i32, i32
  }
  func.func @transform_2(%arg0: i32) -> (i32, i32) {
    %c0_i32 = arith.constant 0 : i32
    %c0_i32_0 = arith.constant 0 : i32
    return %arg0, %c0_i32 : i32, i32
  }
  func.func @transform_3(%arg0: i32) -> (i32, i32) {
    %c0_i32 = arith.constant 0 : i32
    %c0_i32_0 = arith.constant 0 : i32
    %c0_i32_1 = arith.constant 0 : i32
    return %c0_i32, %c0_i32_0 : i32, i32
  }
  func.func @transform_4(%arg0: i32) -> (i32, i32) {
    %c0_i32 = arith.constant 0 : i32
    %c0_i32_0 = arith.constant 0 : i32
    %c0_i32_1 = arith.constant 0 : i32
    return %c0_i32, %c0_i32_0 : i32, i32
  }
  func.func @transform_5(%arg0: i32) -> (i32, i32) {
    %c0_i32 = arith.constant 0 : i32
    %c0_i32_0 = arith.constant 0 : i32
    %c0_i32_1 = arith.constant 0 : i32
    return %c0_i32, %c0_i32_0 : i32, i32
  }
  func.func @transform_6(%arg0: i32) -> (i32, i32) {
    %c0_i32 = arith.constant 0 : i32
    %c0_i32_0 = arith.constant 0 : i32
    %c0_i32_1 = arith.constant 0 : i32
    return %c0_i32, %c0_i32_0 : i32, i32
  }
  func.func @transform_7(%arg0: i32) -> i32 {
    %c0_i32 = arith.constant 0 : i32
    %c0_i32_0 = arith.constant 0 : i32
    return %c0_i32 : i32
  }
  func.func @transform_8(%arg0: i32) -> (i32, i32) {
    %c0_i32 = arith.constant 0 : i32
    %c0_i32_0 = arith.constant 0 : i32
    return %arg0, %c0_i32 : i32, i32
  }
}

</mosaic_0001>

<bundles_post_ra>
// kernel: tpu_custom_call.1
= control target key start
LH: loop header
LB: loop body
LE: loop exit
PB: predicated region body
PF: predicated region fallthrough
CT: control target
= control target key end

     0   :  { %s3528_s29 = smov 0   ;;  %s4672_s0 = inlined_call_operand.vmem [shape: f32[64,24], index: 0, kind: input, shape index: {}]   ;;  %s4673_s1 = inlined_call_operand.vmem [shape: f32[64,8,40], index: 1, kind: input, shape index: {}]   ;;  %s4674_s2 = inlined_call_operand.vmem [shape: f32[64,8], index: 2, kind: input, shape index: {}]   ;;  %s4675_s3 = inlined_call_operand.vmem [shape: f32[24,32], index: 3, kind: input, shape index: {}]   ;;  %s4676_s4 = inlined_call_operand.vmem [shape: f32[40,32], index: 4, kind: input, shape index: {}]   ;;  %s4677_s5 = inlined_call_operand.vmem [shape: f32[1,32], index: 5, kind: input, shape index: {}]   ;;  %s4678_s6 = inlined_call_operand.vmem [shape: f32[1,32], index: 6, kind: input, shape index: {}]   ;;  %s4679_s7 = inlined_call_operand.<no memory space> [shape: f32[1], index: 7, kind: input, shape index: {}]   ;;  %s4680_s8 = inlined_call_operand.vmem [shape: f32[64,24], index: 8, kind: output, shape index: {}]  }
   0x1   :  { %13 = sst [smem:[#allocation2]] %s4679_s7 }
   0x2 LB: > { %s2858_s30 = sadd.s32 4294967295, %s3477_s29   ;;  %p2862_p0 = scmp.ge.s32.totalorder %s3477_s29, 1  ;;  %s3477_s29 = sphi %s3528_s29, %s19_s29  }
   0x3   : > { %p286_p1 = scmp.lt.s32.totalorder %s3477_s29, 3 }
   0x5   : > { %p287_p2 = pnand %p2862_p0, %p286_p1 }
   0x7   : > { %290 = sbr.rel (%p287_p2) target bundleno = 676 (0x2a4), region = 52 }
   0xe   : > { %v358_v0 = vld [vmem:[%s4675_s3] sm:$0xff]  ;;  %v359_v1 = vld [vmem:[%s4675_s3 + $0x8] sm:$0xff]  ;;  %s2863_s14 = sshll.u32 %s2858_s30, 2  ;;  %s2865_s15 = sshll.u32 %s2858_s30, 5  ;;  %v833_v3 = vlaneseq  ;;  %v500_v6 = vld [vmem:[%s4676_s4 + $0x10] sm:$0xff]  ;;  %vm368_vm0 = vcmask 195584  }
   0xf   : > { %v498_v2 = vld [vmem:[%s4676_s4] sm:$0xff]  ;;  %v3089_v4 = vpack.c.bf16 %v359_v1, %v358_v0  ;;  %v499_v5 = vld [vmem:[%s4676_s4 + $0x8] sm:$0xff]  ;;  %p331_p3 = scmp.lt.s32.totalorder %s2863_s14, 7  ;;  %p337_p4 = scmp.lt.s32.totalorder %s2865_s15, 63  ;;  %v360_v8 = vld [vmem:[%s4675_s3 + $0x10] sm:$0xff]  ;;  %vm503_vm1 = vcmask 326656  }
  0x10   : > { %v3093_v7 = vpack.c.bf16 %v499_v5, %v498_v2  ;;  %v501_v9 = vld [vmem:[%s4676_s4 + $0x18] sm:$0xff]  ;;  %v3557_v11 = vshrl.u32 %v833_v3, 7  ;;  %v502_v13 = vld [vmem:[%s4676_s4 + $0x20] sm:$0xff]  ;;  %vm1480_vm2 = vcmask 261120   ;;  %s1577_s19 = sld [smem:[#allocation2]]  ;;  %vm2735_vm3 = vcmask 1041409  }
  0x11   : > { %3090 = vmatprep.subr.bf16.mxu0 %v3089_v4  ;;  %v3097_v10 = vpack.c.bf16 %v501_v9, %v500_v6  ;;  %s4689_s14 = smov (!%p331_p3, %s2863_s14), 7  ;;  %s4691_s15 = smov (!%p337_p4, %s2865_s15), 63  ;;  %vm2737_vm4 = vcmask 1042434   ;;  %vm2739_vm5 = vcmask 1043459   ;;  %vm2741_vm6 = vcmask 1044484  }
  0x12   : > { %3101 = vmatprep.subr.bf16.mxu1 %v3093_v7  ;;  %3092 = vmatpush3.bf16.msra.mxu0 %v3089_v4  ;;  %s3559_s24 = sshll.u32 %s4689_s14, 3  ;;  %s2866_s11 = sshll.u32 %s4691_s15, 3  ;;  %v3581_v15 = vsub.s32 1, %v3557_v11  ;;  %v3592_v22 = vsub.s32 0, %v3557_v11  ;;  %v3599_v25 = vsub.s32 2, %v3557_v11  ;;  %v3626_v37 = vsub.s32 3, %v3557_v11 }
  0x13   : > { %3104 = vmatpush3.bf16.msra.mxu1 %v3093_v7  ;;  %3023 = vmatprep.subr.mxu0 %v360_v8  ;;  %s334_s27 = scalar_lea.vmem %s4672_s0, %s3559_s24  ;;  %s3569_s9 = scalar_lea.vmem %s4674_s2, %s3559_s24  ;;  %v3656_v51 = vsub.s32 4, %v3557_v11  ;;  %v3675_v61 = vsub.s32 5, %v3557_v11  ;;  %vm2743_vm7 = vcmask 1045509   ;;  %vm2745_vm8 = vcmask 1046534  }
  0x14   : > { %3102 = vmatprep.subr.bf16.mxu1 %v3097_v10  ;;  %v354_v12 = vld [vmem:[%s334_s27] sm:$0xff]  ;;  %v355_v14 = vld [vmem:[%s334_s27 + $0x8] sm:$0xff]  ;;  %s3578_s14 = scalar_lea.vmem %s4673_s1, %s2866_s11  ;;  %v356_v17 = vld [vmem:[%s334_s27 + $0x10] sm:$0xff]  ;;  %s4524_s22 = scalar_lea.vmem %s4680_s8, %s3559_s24  ;;  %vm2747_vm9 = vcmask 1047559  }
  0x15   : > { %3025 = vmatprep.mubr.msk.f32.mxu0 %vm368_vm0, %v354_v12  ;;  %v3584_v16 = vld [vmem:[%s3569_s9] sm:$0xff]  ;;  %v480_v18 = vld [vmem:[%s3578_s14 + $0x70] sm:$0xff]  ;;  %v357_v19 = vld [vmem:[%s334_s27 + $0x18] sm:$0xff] }
  0x16   : > { %3024 = vmatpush3.msra.mxu0 %v360_v8  ;;  %v481_v20 = vld [vmem:[%s3578_s14 + $0x78] sm:$0xff]  ;;  %v466_v21 = vld [vmem:[%s3578_s14] sm:$0xff]  ;;  %3062 = vmatprep.mubr.msk.f32.mxu1 %vm503_vm1, %v480_v18  ;;  %v1817_v24 = vrot.slane %v3584_v16, %v3581_v15  ;;  %v1810_v26 = vrot.slane %v3584_v16, %v3592_v22  ;;  %v483_v27 = vld [vmem:[%s3578_s14 + $0x88] sm:$0xff]  ;;  %v1824_v30 = vrot.slane %v3584_v16, %v3599_v25 }
  0x17   : > { %3105 = vmatpush3.bf16.msra.mxu1 %v3097_v10  ;;  %3026 = vmatmul.mubr.msk.f32.vlgmr.msra.gmra.mrb[0].mxu0 %vm368_vm0, %v355_v14  ;;  %v482_v23 = vld [vmem:[%s3578_s14 + $0x80] sm:$0xff]  ;;  %v3609_v28 = vld [vmem:[%s3569_s9 + $0x8] sm:$0xff]  ;;  %v484_v29 = vld [vmem:[%s3578_s14 + $0x90] sm:$0xff]  ;;  %v1831_v44 = vrot.slane %v3584_v16, %v3626_v37  ;;  %v1838_v58 = vrot.slane %v3584_v16, %v3656_v51  ;;  %v1845_v3 = vrot.slane %v3584_v16, %v3675_v61 }
  0x18   : > { %3094 = vmatprep.subr.bf16.mxu0 %v3093_v7  ;;  %3103 = vmatprep.subr.mxu1 %v502_v13  ;;  %v467_v31 = vld [vmem:[%s3578_s14 + $0x8] sm:$0xff]  ;;  %v1873_v32 = vrot.slane %v3609_v28, %v3581_v15  ;;  %v468_v33 = vld [vmem:[%s3578_s14 + $0x10] sm:$0xff]  ;;  %v485_v34 = vld [vmem:[%s3578_s14 + $0x98] sm:$0xff]  ;;  %v1866_v36 = vrot.slane %v3609_v28, %v3592_v22  ;;  %v1880_v39 = vrot.slane %v3609_v28, %v3599_v25 }
  0x19   : > { %3096 = vmatpush3.bf16.msra.mxu0 %v3093_v7  ;;  %3028 = vmatprep.mubr.msk.f32.mxu0 %vm368_vm0, %v356_v17  ;;  %v486_v35 = vld [vmem:[%s3578_s14 + $0xa0] sm:$0xff]  ;;  %v469_v38 = vld [vmem:[%s3578_s14 + $0x18] sm:$0xff]  ;;  %v487_v41 = vld [vmem:[%s3578_s14 + $0xa8] sm:$0xff]  ;;  %v1887_v53 = vrot.slane %v3609_v28, %v3626_v37 }
  0x1a   : > { %3098 = vmatprep.subr.bf16.mxu0 %v3097_v10  ;;  %1819 = vbcast.lane.b32.xlu1 %v1817_v24, 256  ;;  %v470_v40 = vld [vmem:[%s3578_s14 + $0x20] sm:$0xff]  ;;  %v3637_v42 = vld [vmem:[%s3569_s9 + $0x10] sm:$0xff]  ;;  %v471_v45 = vld [vmem:[%s3578_s14 + $0x28] sm:$0xff]  ;;  %v3479_v24 = vmov 1966171168  }
  0x1b   : > { %3106 = vmatpush3.msra.mxu1 %v502_v13  ;;  %3029 = vmatmul.mubr.msk.f32.gmra.mrb[2].mxu0 %vm368_vm0, %v357_v19  ;;  %v488_v43 = vld [vmem:[%s3578_s14 + $0xb0] sm:$0xff]  ;;  %v1929_v46 = vrot.slane %v3637_v42, %v3581_v15  ;;  %v489_v48 = vld [vmem:[%s3578_s14 + $0xb8] sm:$0xff]  ;;  %v490_v49 = vld [vmem:[%s3578_s14 + $0xc0] sm:$0xff]  ;;  %v1922_v50 = vrot.slane %v3637_v42, %v3592_v22  ;;  %v1936_v1 = vrot.slane %v3637_v42, %v3599_v25 }
  0x1c   : > { %3063 = vmatmul.mubr.msk.f32.vlgmr.msra.gmra.mrb[0].mxu1 %vm503_vm1, %v481_v20  ;;  %3041 = vmatprep.mubr.msk.f32.mxu0 %vm503_vm1, %v466_v21  ;;  %v472_v47 = vld [vmem:[%s3578_s14 + $0x30] sm:$0xff]  ;;  %v473_v52 = vld [vmem:[%s3578_s14 + $0x38] sm:$0xff]  ;;  %v474_v54 = vld [vmem:[%s3578_s14 + $0x40] sm:$0xff]  ;;  %v1943_v14 = vrot.slane %v3637_v42, %v3626_v37  ;;  %v1950_v20 = vrot.slane %v3637_v42, %v3656_v51  ;;  %v3721_v21 = vsub.s32 7, %v3557_v11 }
  0x1d   : > { %3100 = vmatpush3.bf16.msra.mxu0 %v3097_v10  ;;  %3065 = vmatprep.mubr.msk.f32.mxu1 %vm503_vm1, %v482_v23  ;;  %v491_v55 = vld [vmem:[%s3578_s14 + $0xc8] sm:$0xff]  ;;  %v1806_v56 = vld [vmem:[%s3569_s9 + $0x18] sm:$0xff]  ;;  %v492_v57 = vld [vmem:[%s3578_s14 + $0xd0] sm:$0xff]  ;;  %v1894_v10 = vrot.slane %v3609_v28, %v3656_v51 }
  0x1e   : > { %3039 = vmatprep.subr.mxu0 %v502_v13  ;;  %1812 = vbcast.lane.b32.xlu0 %v1810_v26, 256  ;;  %v475_v59 = vld [vmem:[%s3578_s14 + $0x48] sm:$0xff]  ;;  %v1978_v60 = vrot.slane %v1806_v56, %v3592_v22  ;;  %v476_v62 = vld [vmem:[%s3578_s14 + $0x50] sm:$0xff]  ;;  %v493_v63 = vld [vmem:[%s3578_s14 + $0xd8] sm:$0xff]  ;;  %v1985_v7 = vrot.slane %v1806_v56, %v3581_v15  ;;  %v1992_v12 = vrot.slane %v1806_v56, %v3599_v25  ;;  %v3711_v15 = vsub.s32 6, %v3557_v11 }
  0x1f   : > { %1826 = vbcast.lane.b32.xlu1 %v1824_v30, 256  ;;  %v494_v0 = vld [vmem:[%s3578_s14 + $0xe0] sm:$0xff]  ;;  %v477_v2 = vld [vmem:[%s3578_s14 + $0x58] sm:$0xff]  ;;  %v495_v5 = vld [vmem:[%s3578_s14 + $0xe8] sm:$0xff]  ;;  %v1999_v17 = vrot.slane %v1806_v56, %v3626_v37  ;;  %4683 = vst [vmem:[#allocation3_spill] sm:$0xff] %v3721_v21  ;;  %v1859_v23 = vrot.slane %v3584_v16, %v3721_v21  ;;  %v831_v25 = vunpack.c.l.s4 %v3479_v24 }
  0x20   : > { %3066 = vmatmul.mubr.msk.f32.gmra.mrb[2].mxu1 %vm503_vm1, %v483_v27  ;;  %v478_v4 = vld [vmem:[%s3578_s14 + $0x60] sm:$0xff]  ;;  %v496_v6 = vld [vmem:[%s3578_s14 + $0xf0] sm:$0xff]  ;;  %v479_v8 = vld [vmem:[%s3578_s14 + $0x68] sm:$0xff]  ;;  %v1852_v18 = vrot.slane %v3584_v16, %v3711_v15  ;;  %v1908_v19 = vrot.slane %v3609_v28, %v3711_v15 }
  0x21   : > { %3040 = vmatpush3.msra.mxu0 %v502_v13  ;;  %3068 = vmatprep.mubr.msk.f32.mxu1 %vm503_vm1, %v484_v29  ;;  %v497_v9 = vld [vmem:[%s3578_s14 + $0xf8] sm:$0xff]  ;;  %v1901_v13 = vrot.slane %v3609_v28, %v3675_v61  ;;  %v832_v26 = vunpack.c.0.s8 %v831_v25  ;;  %v2871_v27 = vld [vmem:[%s4677_s5] ss:$0 sm:$0xff] }
  0x22   : > { %3042 = vmatmul.mubr.msk.f32.vlgmr.msra.gmra.mrb[4].mxu0 %vm503_vm1, %v467_v31  ;;  %1875 = vbcast.lane.b32.xlu0 %v1873_v32, 256 }
  0x23   : > { %3044 = vmatprep.mubr.msk.f32.mxu0 %vm503_vm1, %v468_v33  ;;  %1868 = vbcast.lane.b32.xlu1 %v1866_v36, 256  ;;  %v3729_v28 = vsub.s32 %v832_v26, %v3557_v11 }
  0x24   : > { %3069 = vmatmul.mubr.msk.f32.gmra.mrb[4].mxu1 %vm503_vm1, %v485_v34 }
  0x25   : > { %3071 = vmatprep.mubr.msk.f32.mxu1 %vm503_vm1, %v486_v35 }
  0x26   : > { %3045 = vmatmul.mubr.msk.f32.gmra.mrb[6].mxu0 %vm503_vm1, %v469_v38  ;;  %1882 = vbcast.lane.b32.xlu0 %v1880_v39, 256 }
  0x27   : > { %3047 = vmatprep.mubr.msk.f32.mxu0 %vm503_vm1, %v470_v40  ;;  %1833 = vbcast.lane.b32.xlu1 %v1831_v44, 256 }
  0x28   : > { %3072 = vmatmul.mubr.msk.f32.gmra.mrb[6].mxu1 %vm503_vm1, %v487_v41 }
  0x29   : > { %3074 = vmatprep.mubr.msk.f32.mxu1 %vm503_vm1, %v488_v43 }
  0x2a   : > { %3048 = vmatmul.mubr.msk.f32.gmra.mrb[8].mxu0 %vm503_vm1, %v471_v45  ;;  %1931 = vbcast.lane.b32.xlu0 %v1929_v46, 256 }
  0x2b   : > { %3050 = vmatprep.mubr.msk.f32.mxu0 %vm503_vm1, %v472_v47  ;;  %1924 = vbcast.lane.b32.xlu1 %v1922_v50, 256 }
  0x2c   : > { %3075 = vmatmul.mubr.msk.f32.gmra.mrb[8].mxu1 %vm503_vm1, %v489_v48 }
  0x2d   : > { %3077 = vmatprep.mubr.msk.f32.mxu1 %vm503_vm1, %v490_v49 }
  0x2e   : > { %3051 = vmatmul.mubr.msk.f32.gmra.mrb[10].mxu0 %vm503_vm1, %v473_v52  ;;  %1889 = vbcast.lane.b32.xlu0 %v1887_v53, 256 }
  0x2f   : > { %3053 = vmatprep.mubr.msk.f32.mxu0 %vm503_vm1, %v474_v54  ;;  %1840 = vbcast.lane.b32.xlu1 %v1838_v58, 256 }
  0x30   : > { %3078 = vmatmul.mubr.msk.f32.gmra.mrb[10].mxu1 %vm503_vm1, %v491_v55 }
  0x31   : > { %3080 = vmatprep.mubr.msk.f32.mxu1 %vm503_vm1, %v492_v57 }
  0x32   : > { %3054 = vmatmul.mubr.msk.f32.gmra.mrb[12].mxu0 %vm503_vm1, %v475_v59  ;;  %1980 = vbcast.lane.b32.xlu0 %v1978_v60, 256 }
  0x33   : > { %3056 = vmatprep.mubr.msk.f32.mxu0 %vm503_vm1, %v476_v62  ;;  %1938 = vbcast.lane.b32.xlu1 %v1936_v1, 256 }
  0x34   : > { %3081 = vmatmul.mubr.msk.f32.gmra.mrb[12].mxu1 %vm503_vm1, %v493_v63 }
  0x35   : > { %3083 = vmatprep.mubr.msk.f32.mxu1 %vm503_vm1, %v494_v0 }
  0x36   : > { %3057 = vmatmul.mubr.msk.f32.gmra.mrb[14].mxu0 %vm503_vm1, %v477_v2  ;;  %1847 = vbcast.lane.b32.xlu0 %v1845_v3, 256 }
  0x37   : > { %3059 = vmatprep.mubr.msk.f32.mxu0 %vm503_vm1, %v478_v4  ;;  %1987 = vbcast.lane.b32.xlu1 %v1985_v7, 256 }
  0x38   : > { %3084 = vmatmul.mubr.msk.f32.gmra.mrb[14].mxu1 %vm503_vm1, %v495_v5 }
  0x39   : > { %3086 = vmatprep.mubr.msk.f32.mxu1 %vm503_vm1, %v496_v6 }
  0x3a   : > { %3060 = vmatmul.mubr.msk.f32.gmra.mrb[16].mxu0 %vm503_vm1, %v479_v8  ;;  %1945 = vbcast.lane.b32.xlu0 %v1943_v14, 256 }
  0x3b   : > { %1896 = vbcast.lane.b32.xlu1 %v1894_v10, 256 }
  0x3c   : > { %3087 = vmatmul.mubr.msk.f32.gmra.mrb[16].mxu1 %vm503_vm1, %v497_v9 }
  0x3e   : > { %1854 = vbcast.lane.b32.xlu0 %v1852_v18, 256 }
  0x3f   : > { %1994 = vbcast.lane.b32.xlu1 %v1992_v12, 256 }
  0x42   : > { %1952 = vbcast.lane.b32.xlu0 %v1950_v20, 256 }
  0x43   : > { %1903 = vbcast.lane.b32.xlu1 %v1901_v13, 256 }
  0x46   : > { %1861 = vbcast.lane.b32.xlu0 %v1859_v23, 256 }
  0x47   : > { %2001 = vbcast.lane.b32.xlu1 %v1999_v17, 256 }
  0x4b   : > { %1910 = vbcast.lane.b32.xlu1 %v1908_v19, 256 }
  0xea   : > { %v3027_v29 = vpop.f32.mrb[0].mxu0 }
  0xeb   : > { %v3731_v30 = vadd.f32 %v3027_v29, %v2871_v27  ;;  %v447_v31 = vpop.f32.mrb[1].mxu0 }
  0xec   : > { %v448_v32 = vadd.f32 %v2871_v27, %v447_v31 }
  0xed   : > { %v878_v33 = vcombine.high %v3731_v30, %v3731_v30 }
  0xee   : > { %v836_v16 = vrot.slane %v448_v32, %v3729_v28  ;;  %v3030_v34 = vpop.f32.mrb[2].mxu0  ;;  %v829_v36 = vcombine.high %v448_v32, %v448_v32 }
  0xef   : > { %v892_v35 = vrot.slane %v878_v33, %v3729_v28  ;;  %v457_v37 = vpop.f32.mrb[3].mxu0  ;;  %v3064_v38 = vpop.f32.mrb[0].mxu1  ;;  %v3741_v44 = vadd.f32 %v3030_v34, %v2871_v27 }
  0xf0   : > { %v844_v39 = vcombine.high %v836_v16, %v836_v16  ;;  %v458_v40 = vadd.f32 %v2871_v27, %v457_v37  ;;  %v852_v11 = vrot.slane %v836_v16, %v3729_v28  ;;  %v736_v41 = vpop.f32.mrb[1].mxu1  ;;  %v3746_v48 = vrot.slane %v829_v36, %v3729_v28 }
  0xf1   : > { %v894_v42 = vcombine.high %v892_v35, %v892_v35  ;;  %v3739_v43 = vrot.slane %v892_v35, %v3729_v28 }
  0xf2   : > { %v927_v45 = vcombine.high %v458_v40, %v458_v40  ;;  %v934_v46 = vrot.slane %v458_v40, %v3729_v28  ;;  %v866_v47 = vrot.slane %v844_v39, %v3729_v28  ;;  %v1028_v50 = vrot.slane %v852_v11, %v3592_v22 }
  0xf3   : > { %v3749_v49 = vrot.slane %v894_v42, %v3729_v28  ;;  %v924_v52 = vcombine.high %v3739_v43, %v3739_v43  ;;  %v3067_v53 = vpop.f32.mrb[2].mxu1  ;;  %v874_v0 = vcombine.high %v852_v11, %v852_v11 }
  0xf4   : > { %v941_v54 = vrot.slane %v927_v45, %v3729_v28  ;;  %v942_v55 = vcombine.high %v934_v46, %v934_v46  ;;  %v1032_v56 = vrot.slane %v866_v47, %v3592_v22  ;;  %v746_v57 = vpop.f32.mrb[3].mxu1  ;;  %v950_v58 = vrot.slane %v934_v46, %v3729_v28 }
  0xf5   : > { %v926_v59 = vcombine.high %v3749_v49, %v3749_v49  ;;  %v3043_v60 = vpop.f32.mrb[4].mxu0  ;;  %v1084_v62 = vrot.slane %v924_v52, %v3592_v22  ;;  %v876_v63 = vcombine.high %v866_v47, %v866_v47  ;;  %v1036_v25 = vrot.slane %v874_v0, %v3592_v22 }
  0xf6   : > { %v3760_v1 = vadd.f32 %v3043_v60, %v1032_v56  ;;  %v666_v2 = vpop.f32.mrb[5].mxu0  ;;  %v964_v3 = vrot.slane %v942_v55, %v3729_v28  ;;  %v1092_v4 = vrot.slane %v950_v58, %v3592_v22  ;;  %v972_v5 = vcombine.high %v950_v58, %v950_v58 }
  0xf7   : > { %v1088_v6 = vrot.slane %v926_v59, %v3592_v22  ;;  %v3765_v7 = vadd.f32 %v1028_v50, %v666_v2  ;;  %v3767_v8 = vadd.f32 %v1084_v62, %v736_v41  ;;  %v3070_v9 = vpop.f32.mrb[4].mxu1  ;;  %v1040_v10 = vrot.slane %v876_v63, %v3592_v22 }
  0xf8   : > { %v2909_v12 = vmul.f32 -1.442695, %v3760_v1  ;;  %v1096_v13 = vrot.slane %v964_v3, %v3592_v22  ;;  %v3772_v14 = vadd.f32 %v1092_v4, %v746_v57  ;;  %v974_v17 = vcombine.high %v964_v3, %v964_v3  ;;  %v756_v18 = vpop.f32.mrb[5].mxu1 }
  0xf9   : > { %v3774_v19 = vadd.f32 %v3064_v38, %v1088_v6  ;;  %v2908_v20 = vmul.f32 -1.442695, %v3765_v7  ;;  %v2922_v23 = vmul.f32 -1.442695, %v3767_v8  ;;  %v3046_v24 = vpop.f32.mrb[6].mxu0  ;;  %v1100_v37 = vrot.slane %v972_v5, %v3592_v22 }
  0xfa   : > { %3116 = vpow2.f32 %v2909_v12  ;;  %v3779_v26 = vadd.f32 %v3067_v53, %v1096_v13  ;;  %v2924_v27 = vmul.f32 -1.442695, %v3772_v14  ;;  %v1104_v29 = vrot.slane %v974_v17, %v3592_v22  ;;  %v676_v31 = vpop.f32.mrb[7].mxu0 }
  0xfb   : > { %v2923_v32 = vmul.f32 -1.442695, %v3774_v19  ;;  %3118 = vpow2.f32 %v2908_v20  ;;  %v3784_v33 = vadd.f32 %v3046_v24, %v1040_v10  ;;  %v3786_v16 = vadd.f32 %v1036_v25, %v676_v31  ;;  %v3073_v34 = vpop.f32.mrb[6].mxu1 }
  0xfc   : > { %3120 = vpow2.f32 %v2922_v23  ;;  %v2925_v35 = vmul.f32 -1.442695, %v3779_v26  ;;  %v3789_v36 = vadd.f32 %v3070_v9, %v1104_v29  ;;  %v766_v38 = vpop.f32.mrb[7].mxu1  ;;  %v943_v40 = vcombine.high %v941_v54, %v941_v54 }
  0xfd   : > { %3122 = vpow2.f32 %v2923_v32  ;;  %v2911_v39 = vmul.f32 -1.442695, %v3784_v33  ;;  %v3049_v11 = vpop.f32.mrb[8].mxu0  ;;  %v3793_v41 = vadd.f32 %v1100_v37, %v756_v18  ;;  %v957_v42 = vrot.slane %v941_v54, %v3729_v28 }
  0xfe   : > { %3124 = vpow2.f32 %v2925_v35  ;;  %v686_v45 = vpop.f32.mrb[9].mxu0  ;;  %v971_v46 = vrot.slane %v943_v40, %v3729_v28  ;;  %v845_v47 = vcombine.high %v3746_v48, %v3746_v48  ;;  %v859_v50 = vrot.slane %v3746_v48, %v3729_v28 }
  0xff   : > { %3126 = vpow2.f32 %v2924_v27  ;;  %v3076_v52 = vpop.f32.mrb[8].mxu1  ;;  %v983_v53 = vrot.slane %v3741_v44, %v3729_v28  ;;  %v2910_v55 = vmul.f32 -1.442695, %v3786_v16  ;;  %v1108_v56 = vrot.slane %v957_v42, %v3592_v22 }
 0x100   : > { %v776_v57 = vpop.f32.mrb[9].mxu1  ;;  %v973_v54 = vcombine.high %v957_v42, %v957_v42  ;;  %3128 = vpow2.f32 %v2911_v39  ;;  %v1112_v58 = vrot.slane %v971_v46, %v3592_v22  ;;  %v873_v59 = vrot.slane %v845_v47, %v3729_v28 }
 0x101   : > { %v1044_v60 = vrot.slane %v859_v50, %v3592_v22  ;;  %v3052_v62 = vpop.f32.mrb[10].mxu0  ;;  %v885_v48 = vrot.slane %v3731_v30, %v3729_v28  ;;  %v3810_v63 = vadd.f32 %v1108_v56, %v766_v38  ;;  %v975_v0 = vcombine.high %v971_v46, %v971_v46 }
 0x102   : > { %v1116_v2 = vrot.slane %v973_v54, %v3592_v22  ;;  %v696_v3 = vpop.f32.mrb[11].mxu0  ;;  %v2927_v4 = vmul.f32 -1.442695, %v3789_v36  ;;  %v3814_v5 = vadd.f32 %v3073_v34, %v1112_v58  ;;  %v1048_v6 = vrot.slane %v873_v59, %v3592_v22 }
 0x103   : > { %v3817_v9 = vadd.f32 %v1044_v60, %v686_v45  ;;  %v3079_v10 = vpop.f32.mrb[10].mxu1  ;;  %3130 = vpow2.f32 %v2910_v55  ;;  %v1120_v13 = vrot.slane %v975_v0, %v3592_v22  ;;  %v877_v17 = vcombine.high %v873_v59, %v873_v59 }
 0x104   : > { %v3117_v12 = vpop.eup %3116  ;;  %v3820_v30 = vadd.f32 %v1116_v2, %v776_v57  ;;  %v786_v18 = vpop.f32.mrb[11].mxu1  ;;  %v991_v23 = vcombine.high %v983_v53, %v983_v53  ;;  %v2926_v24 = vmul.f32 -1.442695, %v3793_v41  ;;  %v3823_v25 = vadd.f32 %v3049_v11, %v1048_v6 }
 0x105   : > { %v3119_v20 = vpop.eup %3118  ;;  %v3055_v27 = vpop.f32.mrb[12].mxu0  ;;  %v2928_v31 = vmul.f32 -1.442695, %v3810_v63  ;;  %v3826_v32 = vadd.f32 %v3076_v52, %v1120_v13  ;;  %v1314_v37 = vadd.f32 1.0, %v3117_v12  ;;  %v1056_v38 = vrot.slane %v877_v17, %v3592_v22 }
 0x106   : > { %v3121_v29 = vpop.eup %3120  ;;  %v706_v34 = vpop.f32.mrb[13].mxu0  ;;  %v893_v42 = vcombine.high %v885_v48, %v885_v48  ;;  %v1313_v45 = vadd.f32 1.0, %v3119_v20  ;;  %3132 = vpow2.f32 %v2927_v4  ;;  %v875_v46 = vcombine.high %v859_v50, %v859_v50 }
 0x107   : > { %v3123_v35 = vpop.eup %3122  ;;  %v3829_v39 = vpop.f32.mrb[12].mxu1  ;;  %v1327_v55 = vadd.f32 1.0, %v3121_v29  ;;  %3134 = vpow2.f32 %v2926_v24  ;;  %v3831_v56 = vadd.f32 %v3052_v62, %v1056_v38  ;;  %v1013_v52 = vrot.slane %v991_v23, %v3729_v28 }
 0x108   : > { %v3125_v40 = vpop.eup %3124  ;;  %v796_v11 = vpop.f32.mrb[13].mxu1  ;;  %v1328_v54 = vadd.f32 1.0, %v3123_v35  ;;  %3136 = vpow2.f32 %v2928_v31  ;;  %v1052_v58 = vrot.slane %v875_v46, %v3592_v22  ;;  %v999_v59 = vrot.slane %v983_v53, %v3729_v28 }
 0x109   : > { %v3127_v47 = vpop.eup %3126  ;;  %v3834_v57 = vpop.f32.mrb[14].mxu0  ;;  %3138 = vrcp.f32 %v1314_v37  ;;  %v1330_v50 = vadd.f32 1.0, %v3125_v40  ;;  %v1128_v2 = vrot.slane %v1013_v52, %v3592_v22  ;;  %v901_v62 = vrot.slane %v885_v48, %v3729_v28 }
 0x10a   : > { %v3838_v60 = vpop.f32.mrb[15].mxu0  ;;  %v3129_v0 = vpop.eup %3128  ;;  %3140 = vrcp.f32 %v1313_v45  ;;  %v1329_v6 = vadd.f32 1.0, %v3127_v47  ;;  %v3844_v12 = vadd.f32 %v1052_v58, %v696_v3  ;;  %v1124_v13 = vrot.slane %v999_v59, %v3592_v22 }
 0x10b   : > { %v3842_v4 = vpop.f32.mrb[14].mxu1  ;;  %3142 = vrcp.f32 %v1327_v55  ;;  %v1316_v53 = vadd.f32 1.0, %v3129_v0  ;;  %v3849_v20 = vadd.f32 %v3079_v10, %v1128_v2  ;;  %v915_v23 = vrot.slane %v893_v42, %v3729_v28 }
 0x10c   : > { %v3847_v17 = vpop.f32.mrb[15].mxu1  ;;  %v976_v48 = vcombine.high %v3741_v44, %v3741_v44  ;;  %3144 = vrcp.f32 %v1328_v54  ;;  %v2929_v3 = vmul.f32 -1.442695, %v3814_v5  ;;  %v3857_v31 = vadd.f32 %v1124_v13, %v786_v18 }
 0x10d   : > { %v3852_v24 = vpop.f32.mrb[16].mxu0  ;;  %v3131_v29 = vpop.eup %3130  ;;  %3146 = vrcp.f32 %v1330_v50  ;;  %v2913_v37 = vmul.f32 -1.442695, %v3823_v25  ;;  %v1064_v10 = vrot.slane %v915_v23, %v3592_v22  ;;  %v1060_v38 = vrot.slane %v901_v62, %v3592_v22 }
 0x10e   : > { %v3859_v35 = vpop.f32.mrb[17].mxu0  ;;  %3148 = vrcp.f32 %v1329_v6  ;;  %v2912_v42 = vmul.f32 -1.442695, %v3817_v9  ;;  %v1023_v44 = vcombine.high %v1013_v52, %v1013_v52  ;;  %v1021_v45 = vcombine.high %v999_v59, %v999_v59 }
 0x10f   : > { %v3864_v40 = vpop.f32.mrb[16].mxu1  ;;  %3150 = vrcp.f32 %v1316_v53  ;;  %v1315_v18 = vadd.f32 1.0, %v3131_v29  ;;  %v3869_v47 = vadd.f32 %v3055_v27, %v1064_v10  ;;  %v3871_v55 = vadd.f32 %v1060_v38, %v706_v34 }
 0x110   : > { %v3867_v46 = vpop.f32.mrb[17].mxu1  ;;  %v3133_v54 = vpop.eup %3132  ;;  %3152 = vpow2.f32 %v2929_v3  ;;  %v2931_v58 = vmul.f32 -1.442695, %v3826_v32  ;;  %v1136_v0 = vrot.slane %v1023_v44, %v3592_v22  ;;  %v1132_v50 = vrot.slane %v1021_v45, %v3592_v22 }
 0x111   : > { %v3135_v2 = vpop.eup %3134  ;;  %v990_v52 = vrot.slane %v976_v48, %v3729_v28  ;;  %3154 = vpow2.f32 %v2913_v37  ;;  %v2930_v59 = vmul.f32 -1.442695, %v3820_v30  ;;  %v2915_v27 = vmul.f32 -1.442695, %v3831_v56 }
 0x112   : > { %v3137_v6 = vpop.eup %3136  ;;  %3156 = vpow2.f32 %v2912_v42  ;;  %v3880_v34 = vadd.f32 %v3829_v39, %v1136_v0  ;;  %v3882_v13 = vadd.f32 %v1132_v50, %v796_v11  ;;  %v2914_v29 = vmul.f32 -1.442695, %v3844_v12 }
 0x113   : > { %v3139_v53 = vpop.eup %3138  ;;  %3158 = vrcp.f32 %v1315_v18  ;;  %v925_v3 = vcombine.high %v915_v23, %v915_v23  ;;  %v923_v10 = vcombine.high %v901_v62, %v901_v62  ;;  %v2933_v48 = vmul.f32 -1.442695, %v3849_v20 }
 0x114   : > { %v3141_v38 = vpop.eup %3140  ;;  %3160 = vpow2.f32 %v2931_v58  ;;  %v2932_v42 = vmul.f32 -1.442695, %v3857_v31  ;;  %v1332_v45 = vadd.f32 1.0, %v3133_v54  ;;  %v992_v18 = vcombine.high %v990_v52, %v990_v52 }
 0x115   : > { %v3143_v37 = vpop.eup %3142  ;;  %3162 = vpow2.f32 %v2930_v59  ;;  %v1072_v44 = vrot.slane %v925_v3, %v3592_v22  ;;  %v1068_v39 = vrot.slane %v923_v10, %v3592_v22  ;;  %v1006_v0 = vrot.slane %v990_v52, %v3729_v28 }
 0x116   : > { %v3145_v11 = vpop.eup %3144  ;;  %3164 = vpow2.f32 %v2915_v27  ;;  %v1331_v62 = vadd.f32 1.0, %v3135_v2  ;;  %v1020_v3 = vrot.slane %v992_v18, %v3729_v28  ;;  %v2916_v52 = vmul.f32 -1.442695, %v3871_v55 }
 0x117   : > { %v3890_v23 = vpop.eup %3146  ;;  %3166 = vpow2.f32 %v2914_v29  ;;  %v3893_v58 = vadd.f32 %v3834_v57, %v1072_v44  ;;  %v3896_v50 = vadd.f32 %v1068_v39, %v3838_v60  ;;  %v1140_v54 = vrot.slane %v1006_v0, %v3592_v22 }
 0x118   : > { %v3149_v59 = vpop.eup %3148  ;;  %3168 = vpow2.f32 %v2933_v48  ;;  %v1333_v2 = vadd.f32 1.0, %v3137_v6  ;;  %v1144_v57 = vrot.slane %v1020_v3, %v3592_v22  ;;  %v2917_v48 = vmul.f32 -1.442695, %v3869_v47 }
 0x119   : > { %v3151_v27 = vpop.eup %3150  ;;  %3170 = vpow2.f32 %v2932_v42  ;;  %v3903_v29 = vadd.f32 %v1140_v54, %v3847_v17  ;;  %v1080_v28 = vrot.slane %v3749_v49, %v3592_v22  ;;  %v1076_v42 = vrot.slane %v3739_v43, %v3592_v22 }
 0x11a   : > { %v3153_v10 = vpop.eup %3152  ;;  %3172 = vrcp.f32 %v1332_v45  ;;  %v1409_v39 = vmul.f32 %v3141_v38, %v3765_v7  ;;  %v1423_v6 = vmul.f32 %v3143_v37, %v3767_v8  ;;  %v2935_v45 = vmul.f32 -1.442695, %v3880_v34 }
 0x11b   : > { %v3155_v60 = vpop.eup %3154  ;;  %3174 = vrcp.f32 %v1331_v62  ;;  %v3914_v17 = vadd.f32 %v3842_v4, %v1144_v57  ;;  %v3917_v54 = vadd.f32 %v3852_v24, %v1080_v28  ;;  %v3920_v49 = vadd.f32 %v1076_v42, %v3859_v35  ;;  %v3926_v4 = vld [vmem:[%s4678_s6] ss:$0 sm:$0xff] }
 0x11c   : > { %v3157_v44 = vpop.eup %3156  ;;  %3176 = vpow2.f32 %v2916_v52  ;;  %v1410_v21 = vmul.f32 %v3139_v53, %v3760_v1  ;;  %v1334_v7 = vadd.f32 1.0, %v3153_v10  ;;  %v1024_v8 = vcombine.high %v1020_v3, %v1020_v3 }
 0x11d   : > { %v3159_v18 = vpop.eup %3158  ;;  %v1317_v62 = vadd.f32 1.0, %v3157_v44  ;;  %3178 = vrcp.f32 %v1333_v2  ;;  %v1424_v37 = vmul.f32 %v3145_v11, %v3774_v19  ;;  %v1318_v52 = vadd.f32 1.0, %v3155_v60 }
 0x11e   : > { %v3161_v43 = vpop.eup %3160  ;;  %3180 = vpow2.f32 %v2917_v48  ;;  %v2934_v24 = vmul.f32 -1.442695, %v3882_v13  ;;  %v1425_v57 = vmul.f32 %v3149_v59, %v3772_v14  ;;  %v1152_v1 = vrot.slane %v1024_v8, %v3592_v22 }
 0x11f   : > { %v3163_v38 = vpop.eup %3162  ;;  %3182 = vpow2.f32 %v2935_v45  ;;  %v1022_v53 = vcombine.high %v1006_v0, %v1006_v0  ;;  %v1336_v10 = vadd.f32 1.0, %v3161_v43  ;;  %v1448_v2 = vmul.f32 %v3926_v4, %v1409_v39 }
 0x120   : > { %v3165_v35 = vpop.eup %3164  ;;  %3184 = vrcp.f32 %v1317_v62  ;;  %v1462_v28 = vmul.f32 %v3926_v4, %v1423_v6  ;;  %v1335_v19 = vadd.f32 1.0, %v3163_v38  ;;  %v3935_v11 = vadd.f32 %v3864_v40, %v1152_v1 }
 0x121   : > { %v3167_v3 = vpop.eup %3166  ;;  %3186 = vrcp.f32 %v1334_v7  ;;  %v1148_v60 = vrot.slane %v1022_v53, %v3592_v22  ;;  %v1320_v59 = vadd.f32 1.0, %v3165_v35  ;;  %v1481_v0 = vsel %vm1480_vm2, %v1448_v2, 0.0 }
 0x122   : > { %v3169_v42 = vpop.eup %3168  ;;  %3188 = vrcp.f32 %v1318_v52  ;;  %v1523_v48 = vsel %vm1480_vm2, %v1462_v28, 0.0  ;;  %v1412_v39 = vmul.f32 %v3151_v27, %v3784_v33  ;;  %v1319_v45 = vadd.f32 1.0, %v3167_v3  ;;  %1482 = vadd.xlane.f32.xlu0 %v1481_v0 }
 0x123   : > { %v3171_v14 = vpop.eup %3170  ;;  %3190 = vpow2.f32 %v2934_v24  ;;  %v3942_v6 = vadd.f32 %v1148_v60, %v3867_v46  ;;  %1524 = vadd.xlane.f32.xlu1 %v1523_v48  ;;  %v1338_v22 = vadd.f32 1.0, %v3169_v42  ;;  %v1449_v62 = vmul.f32 %v3926_v4, %v1410_v21 }
 0x124   : > { %v3173_v44 = vpop.eup %3172  ;;  %3192 = vrcp.f32 %v1336_v10  ;;  %v1464_v43 = vmul.f32 %v3926_v4, %v1425_v57  ;;  %v1426_v7 = vmul.f32 %v3890_v23, %v3779_v26  ;;  %v1411_v8 = vmul.f32 %v3159_v18, %v3786_v16 }
 0x125   : > { %v3175_v40 = vpop.eup %3174  ;;  %3194 = vrcp.f32 %v1335_v19  ;;  %v1337_v33 = vadd.f32 1.0, %v3171_v14  ;;  %v1484_v46 = vsel %vm1480_vm2, %v1449_v62, 0.0  ;;  %v1463_v52 = vmul.f32 %v3926_v4, %v1424_v37 }
 0x126   : > { %v3177_v27 = vpop.eup %3176  ;;  %3196 = vrcp.f32 %v1320_v59  ;;  %v1529_v38 = vsel %vm1480_vm2, %v1464_v43, 0.0  ;;  %v2919_v21 = vmul.f32 -1.442695, %v3893_v58  ;;  %1485 = vadd.xlane.f32.xlu0 %v1484_v46  ;;  %v1451_v26 = vmul.f32 %v3926_v4, %v1412_v39 }
 0x127   : > { %v3179_v24 = vpop.eup %3178  ;;  %3198 = vrcp.f32 %v1319_v45  ;;  %1530 = vadd.xlane.f32.xlu1 %v1529_v38  ;;  %v2936_v16 = vmul.f32 -1.442695, %v3903_v29  ;;  %v1428_v35 = vmul.f32 %v3173_v44, %v3789_v36  ;;  %v1427_v57 = vmul.f32 %v3175_v40, %v3793_v41 }
 0x128   : > { %v3181_v23 = vpop.eup %3180  ;;  %3200 = vrcp.f32 %v1338_v22  ;;  %v1321_v1 = vadd.f32 1.0, %v3177_v27  ;;  %v1526_v53 = vsel %vm1480_vm2, %v1463_v52, 0.0  ;;  %v1490_v3 = vsel %vm1480_vm2, %v1451_v26, 0.0 }
 0x129   : > { %v3183_v18 = vpop.eup %3182  ;;  %3202 = vrcp.f32 %v1337_v33  ;;  %v1465_v10 = vmul.f32 %v3926_v4, %v1426_v7  ;;  %v1450_v2 = vmul.f32 %v3926_v4, %v1411_v8  ;;  %v2918_v42 = vmul.f32 -1.442695, %v3896_v50 }
 0x12a   : > { %v3185_v37 = vpop.eup %3184  ;;  %3204 = vpow2.f32 %v2919_v21  ;;  %1527 = vadd.xlane.f32.xlu0 %v1526_v53  ;;  %v2921_v41 = vmul.f32 -1.442695, %v3917_v54  ;;  %v1429_v60 = vmul.f32 %v3179_v24, %v3810_v63  ;;  %v1340_v59 = vadd.f32 1.0, %v3183_v18 }
 0x12b   : > { %v3187_v28 = vpop.eup %3186  ;;  %1491 = vadd.xlane.f32.xlu1 %v1490_v3  ;;  %3206 = vpow2.f32 %v2936_v16  ;;  %v1413_v14 = vmul.f32 %v3185_v37, %v3817_v9  ;;  %v1532_v48 = vsel %vm1480_vm2, %v1465_v10, 0.0  ;;  %v1487_v44 = vsel %vm1480_vm2, %v1450_v2, 0.0 }
 0x12c   : > { %v3189_v36 = vpop.eup %3188  ;;  %3208 = vrcp.f32 %v1321_v1  ;;  %v1467_v39 = vmul.f32 %v3926_v4, %v1428_v35  ;;  %v1466_v45 = vmul.f32 %v3926_v4, %v1427_v57  ;;  %v2937_v22 = vmul.f32 -1.442695, %v3914_v17 }
 0x12d   : > { %v3191_v19 = vpop.eup %3190  ;;  %3210 = vpow2.f32 %v2918_v42  ;;  %v2920_v9 = vmul.f32 -1.442695, %v3920_v49  ;;  %v1430_v43 = vmul.f32 %v3187_v28, %v3814_v5  ;;  %v1322_v8 = vadd.f32 1.0, %v3181_v23 }
 0x12e   : > { %v3193_v0 = vpop.eup %3192  ;;  %1533 = vadd.xlane.f32.xlu0 %v1532_v48  ;;  %3212 = vpow2.f32 %v2921_v41  ;;  %v1538_v27 = vsel %vm1480_vm2, %v1467_v39, 0.0  ;;  %v1535_v46 = vsel %vm1480_vm2, %v1466_v45, 0.0  ;;  %v1468_v38 = vmul.f32 %v3926_v4, %v1429_v60 }
 0x12f   : > { %v3195_v40 = vpop.eup %3194  ;;  %1488 = vadd.xlane.f32.xlu1 %v1487_v44  ;;  %v1432_v7 = vmul.f32 %v3193_v0, %v3826_v32  ;;  %3214 = vrcp.f32 %v1340_v59  ;;  %v1452_v52 = vmul.f32 %v3926_v4, %v1413_v14  ;;  %v2939_v21 = vmul.f32 -1.442695, %v3935_v11 }
 0x130   : > { %v3197_v63 = vpop.eup %3196  ;;  %3216 = vpow2.f32 %v2937_v22  ;;  %v2938_v5 = vmul.f32 -1.442695, %v3942_v6  ;;  %v1414_v26 = vmul.f32 %v3189_v36, %v3823_v25  ;;  %v1431_v23 = vmul.f32 %v3195_v40, %v3820_v30 }
 0x131   : > { %v3199_v62 = vpop.eup %3198  ;;  %3218 = vpow2.f32 %v2920_v9  ;;  %v1339_v16 = vadd.f32 1.0, %v3191_v19  ;;  %v1541_v35 = vsel %vm1480_vm2, %v1468_v38, 0.0  ;;  %v1493_v57 = vsel %vm1480_vm2, %v1452_v52, 0.0 }
 0x132   : > { %v3201_v33 = vpop.eup %3200  ;;  %1539 = vadd.xlane.f32.xlu0 %v1538_v27  ;;  %3220 = vrcp.f32 %v1322_v8  ;;  %v1469_v1 = vmul.f32 %v3926_v4, %v1430_v43  ;;  %v1471_v37 = vmul.f32 %v3926_v4, %v1432_v7  ;;  %v1416_v30 = vmul.f32 %v3197_v63, %v3831_v56 }
 0x133   : > { %v3203_v24 = vpop.eup %3202  ;;  %1536 = vadd.xlane.f32.xlu1 %v1535_v46  ;;  %3222 = vpow2.f32 %v2939_v21  ;;  %v1434_v10 = vmul.f32 %v3201_v33, %v3849_v20  ;;  %v1453_v41 = vmul.f32 %v3926_v4, %v1414_v26  ;;  %v1470_v19 = vmul.f32 %v3926_v4, %v1431_v23 }
 0x134   : > { %v3205_v32 = vpop.eup %3204  ;;  %3224 = vpow2.f32 %v2938_v5  ;;  %v1544_v42 = vsel %vm1480_vm2, %v1469_v1, 0.0  ;;  %v1550_v36 = vsel %vm1480_vm2, %v1471_v37, 0.0  ;;  %v1415_v56 = vmul.f32 %v3199_v62, %v3844_v12 }
 0x135   : > { %v3207_v18 = vpop.eup %3206  ;;  %v1324_v3 = vadd.f32 1.0, %v3205_v32  ;;  %3226 = vrcp.f32 %v1339_v16  ;;  %v1496_v44 = vsel %vm1480_vm2, %v1453_v41, 0.0  ;;  %v1547_v39 = vsel %vm1480_vm2, %v1470_v19, 0.0 }
 0x136   : > { %v3209_v53 = vpop.eup %3208  ;;  %1542 = vadd.xlane.f32.xlu0 %v1541_v35  ;;  %v1341_v2 = vadd.f32 1.0, %v3207_v18  ;;  %v1455_v45 = vmul.f32 %v3926_v4, %v1416_v30  ;;  %v1473_v40 = vmul.f32 %v3926_v4, %v1434_v10  ;;  %v1433_v12 = vmul.f32 %v3203_v24, %v3857_v31 }
 0x137   : > { %1494 = vadd.xlane.f32.xlu1 %v1493_v57  ;;  %v3211_v25 = vpop.eup %3210  ;;  %3228 = vrcp.f32 %v1324_v3  ;;  %v1417_v20 = vmul.f32 %v3209_v53, %v3871_v55  ;;  %v1454_v33 = vmul.f32 %v3926_v4, %v1415_v56 }
 0x138   : > { %v3213_v28 = vpop.eup %3212  ;;  %v1323_v14 = vadd.f32 1.0, %v3211_v25  ;;  %3230 = vrcp.f32 %v1341_v2  ;;  %v1502_v7 = vsel %vm1480_vm2, %v1455_v45, 0.0  ;;  %v1556_v8 = vsel %vm1480_vm2, %v1473_v40, 0.0  ;;  %v4039_v45 = vpop.permute.xlu1 %1819 }
 0x139   : > { %v3215_v60 = vpop.eup %3214  ;;  %v1326_v0 = vadd.f32 1.0, %v3213_v28  ;;  %v1456_v27 = vmul.f32 %v3926_v4, %v1417_v20  ;;  %v1472_v52 = vmul.f32 %v3926_v4, %v1433_v12  ;;  %v1499_v5 = vsel %vm1480_vm2, %v1454_v33, 0.0  ;;  %v4047_v12 = vpop.permute.xlu0 %1812 }
 0x13a   : > { %1545 = vadd.xlane.f32.xlu0 %v1544_v42  ;;  %v3217_v59 = vpop.eup %3216  ;;  %3232 = vrcp.f32 %v1323_v14  ;;  %v1436_v55 = vmul.f32 %v3215_v60, %v3880_v34 }
 0x13b   : > { %1551 = vadd.xlane.f32.xlu1 %v1550_v36  ;;  %v3219_v48 = vpop.eup %3218  ;;  %v1342_v63 = vadd.f32 1.0, %v3217_v59  ;;  %3234 = vrcp.f32 %v1326_v0  ;;  %v1505_v32 = vsel %vm1480_vm2, %v1456_v27, 0.0 }
 0x13c   : > { %v3221_v22 = vpop.eup %3220  ;;  %v1325_v62 = vadd.f32 1.0, %v3219_v48  ;;  %v1475_v26 = vmul.f32 %v3926_v4, %v1436_v55  ;;  %v4041_v40 = vpop.permute.xlu1 %1826 }
 0x13d   : > { %v3223_v9 = vpop.eup %3222  ;;  %3236 = vrcp.f32 %v1342_v63  ;;  %v1418_v31 = vmul.f32 %v3221_v22, %v3869_v47  ;;  %v1553_v47 = vsel %vm1480_vm2, %v1472_v52, 0.0  ;;  %v3436_v22 = vld [vmem:[%s3569_s9 + $0x18] sm:$0xff] }
 0x13e   : > { %1497 = vadd.xlane.f32.xlu0 %v1496_v44  ;;  %v3225_v43 = vpop.eup %3224  ;;  %v1344_v38 = vadd.f32 1.0, %v3223_v9  ;;  %3238 = vrcp.f32 %v1325_v62  ;;  %v1562_v57 = vsel %vm1480_vm2, %v1475_v26, 0.0  ;;  %v2006_v63 = vrot.slane %v3436_v22, %v3656_v51  ;;  %v4057_v51 = vpop.permute.xlu0 %1875 }
 0x13f   : > { %1548 = vadd.xlane.f32.xlu1 %v1547_v39  ;;  %v3227_v46 = vpop.eup %3226  ;;  %v1343_v34 = vadd.f32 1.0, %v3225_v43  ;;  %v1457_v16 = vmul.f32 %v3926_v4, %v1418_v31  ;;  %v4684_v43 = vld [vmem:[#allocation3_spill] sm:$0xff]  ;;  %v2020_v52 = vrot.slane %v3436_v22, %v3711_v15 }
 0x140   : > { %v1435_v21 = vmul.f32 %v3227_v46, %v3882_v13  ;;  %3240 = vrcp.f32 %v1344_v38  ;;  %v4045_v9 = vpop.permute.xlu1 %1868  ;;  %v2027_v46 = vrot.slane %v3436_v22, %v4684_v43  ;;  %v2013_v38 = vrot.slane %v3436_v22, %v3675_v61 }
 0x141   : > { %v3229_v24 = vpop.eup %3228  ;;  %3242 = vrcp.f32 %v1343_v34  ;;  %v1508_v3 = vsel %vm1480_vm2, %v1457_v16, 0.0 }
 0x142   : > { %1503 = vadd.xlane.f32.xlu0 %v1502_v7  ;;  %v3231_v23 = vpop.eup %3230  ;;  %v1420_v35 = vmul.f32 %v3229_v24, %v3893_v58  ;;  %v1474_v1 = vmul.f32 %v3926_v4, %v1435_v21  ;;  %v4063_v34 = vpop.permute.xlu0 %1882 }
 0x143   : > { %1557 = vadd.xlane.f32.xlu1 %v1556_v8  ;;  %v1437_v13 = vmul.f32 %v3231_v23, %v3903_v29  ;;  %v3438_v8 = vld [vmem:[%s3569_s9 + $0x8] sm:$0xff] }
 0x144   : > { %v3233_v18 = vpop.eup %3232  ;;  %v1559_v10 = vsel %vm1480_vm2, %v1474_v1, 0.0  ;;  %v1459_v58 = vmul.f32 %v3926_v4, %v1420_v35  ;;  %v1915_v33 = vrot.slane %v3438_v8, %v4684_v43  ;;  %v4055_v27 = vpop.permute.xlu1 %1833 }
 0x145   : > { %v3235_v37 = vpop.eup %3234  ;;  %v1419_v53 = vmul.f32 %v3233_v18, %v3896_v50  ;;  %v1476_v29 = vmul.f32 %v3926_v4, %v1437_v13 }
 0x146   : > { %1500 = vadd.xlane.f32.xlu0 %v1499_v5  ;;  %v1422_v30 = vmul.f32 %v3235_v37, %v3917_v54  ;;  %v1514_v41 = vsel %vm1480_vm2, %v1459_v58, 0.0  ;;  %v4068_v21 = vpop.permute.xlu0 %1931 }
 0x147   : > { %1506 = vadd.xlane.f32.xlu1 %v1505_v32  ;;  %v3237_v25 = vpop.eup %3236  ;;  %v1458_v42 = vmul.f32 %v3926_v4, %v1419_v53  ;;  %v1565_v54 = vsel %vm1480_vm2, %v1476_v29, 0.0  ;;  %v4098_v53 = vstv %s1577_s19 }
 0x148   : > { %v3239_v2 = vpop.eup %3238  ;;  %v1438_v28 = vmul.f32 %v3237_v25, %v3914_v17  ;;  %v1461_v19 = vmul.f32 %v3926_v4, %v1422_v30  ;;  %v4061_v31 = vpop.permute.xlu1 %1924 }
 0x149   : > { %v1421_v50 = vmul.f32 %v3239_v2, %v3920_v49  ;;  %v1511_v14 = vsel %vm1480_vm2, %v1458_v42, 0.0 }
 0x14a   : > { %1554 = vadd.xlane.f32.xlu0 %v1553_v47  ;;  %v3241_v36 = vpop.eup %3240  ;;  %v1477_v59 = vmul.f32 %v3926_v4, %v1438_v28  ;;  %v1520_v20 = vsel %vm1480_vm2, %v1461_v19, 0.0  ;;  %v4072_v32 = vpop.permute.xlu0 %1889 }
 0x14b   : > { %1563 = vadd.xlane.f32.xlu1 %v1562_v57  ;;  %v3243_v60 = vpop.eup %3242  ;;  %v1440_v17 = vmul.f32 %v3241_v36, %v3935_v11  ;;  %v1460_v49 = vmul.f32 %v3926_v4, %v1421_v50 }
 0x14c   : > { %v1439_v56 = vmul.f32 %v3243_v60, %v3942_v6  ;;  %v1568_v0 = vsel %vm1480_vm2, %v1477_v59, 0.0  ;;  %v4066_v24 = vpop.permute.xlu1 %1840 }
 0x14d   : > { %v1517_v48 = vsel %vm1480_vm2, %v1460_v49, 0.0  ;;  %v1479_v39 = vmul.f32 %v3926_v4, %v1440_v17 }
 0x14e   : > { %1509 = vadd.xlane.f32.xlu0 %v1508_v3  ;;  %v1478_v44 = vmul.f32 %v3926_v4, %v1439_v56  ;;  %v3437_v4 = vld [vmem:[%s3569_s9 + $0x10] sm:$0xff] }
 0x14f   : > { %1560 = vadd.xlane.f32.xlu1 %v1559_v10  ;;  %v1574_v6 = vsel %vm1480_vm2, %v1479_v39, 0.0  ;;  %v1964_v55 = vrot.slane %v3437_v4, %v3711_v15  ;;  %v1957_v62 = vrot.slane %v3437_v4, %v3675_v61  ;;  %v1971_v7 = vrot.slane %v3437_v4, %v4684_v43  ;;  %v4076_v61 = vpop.permute.xlu0 %1980 }
 0x150   : > { %v1571_v11 = vsel %vm1480_vm2, %v1478_v44, 0.0  ;;  %v4070_v5 = vpop.permute.xlu1 %1938 }
 0x152   : > { %1515 = vadd.xlane.f32.xlu0 %v1514_v41 }
 0x153   : > { %1566 = vadd.xlane.f32.xlu1 %v1565_v54  ;;  %v4080_v47 = vpop.permute.xlu0 %1847 }
 0x154   : > { %v4074_v26 = vpop.permute.xlu1 %1987 }
 0x156   : > { %1512 = vadd.xlane.f32.xlu0 %v1511_v14 }
 0x157   : > { %1521 = vadd.xlane.f32.xlu1 %v1520_v20  ;;  %v4084_v15 = vpop.permute.xlu0 %1945 }
 0x158   : > { %v4078_v23 = vpop.permute.xlu1 %1896 }
 0x15a   : > { %1569 = vadd.xlane.f32.xlu0 %v1568_v0 }
 0x15b   : > { %1518 = vadd.xlane.f32.xlu1 %v1517_v48  ;;  %v4088_v35 = vpop.permute.xlu0 %1854 }
 0x15c   : > { %v4082_v16 = vpop.permute.xlu1 %1994 }
 0x15e   : > { %1572 = vadd.xlane.f32.xlu0 %v1571_v11 }
 0x15f   : > { %1575 = vadd.xlane.f32.xlu1 %v1574_v6  ;;  %v4092_v57 = vpop.permute.xlu0 %1952 }
 0x160   : > { %v4086_v18 = vpop.permute.xlu1 %1903 }
 0x163   : > { %v4096_v37 = vpop.permute.xlu0 %1861 }
 0x164   : > { %v4090_v13 = vpop.permute.xlu1 %2001 }
 0x168   : > { %v4094_v1 = vpop.permute.xlu1 %1910 }
 0x170   : > { %2008 = vbcast.lane.b32.xlu1 %v2006_v63, 256 }
 0x174   : > { %1966 = vbcast.lane.b32.xlu1 %v1964_v55, 256  ;;  %1959 = vbcast.lane.b32.xlu0 %v1957_v62, 256 }
 0x178   : > { %1973 = vbcast.lane.b32.xlu1 %v1971_v7, 256  ;;  %1917 = vbcast.lane.b32.xlu0 %v1915_v33, 256 }
 0x17c   : > { %2029 = vbcast.lane.b32.xlu1 %v2027_v46, 256  ;;  %2015 = vbcast.lane.b32.xlu0 %v2013_v38, 256 }
 0x180   : > { %2022 = vbcast.lane.b32.xlu0 %v2020_v52, 256 }
 0x1af   : > { %v1483_v3 = vpop.xlane.xlu0 %1482 }
 0x1b0   : > { %v1525_v25 = vpop.xlane.xlu1 %1524  ;;  %v1579_v30 = vadd.f32 %v4098_v53, %v1483_v3 }
 0x1b1   : > { %v1593_v10 = vadd.f32 %v4098_v53, %v1525_v25 }
 0x1b2   : > { %v2941_v58 = vmul.f32 -1.442695, %v1579_v30 }
 0x1b3   : > { %v2955_v29 = vmul.f32 -1.442695, %v1593_v10  ;;  %v1486_v2 = vpop.xlane.xlu0 %1485 }
 0x1b4   : > { %v1531_v28 = vpop.xlane.xlu1 %1530  ;;  %3244 = vpow2.f32 %v2941_v58  ;;  %v1580_v42 = vadd.f32 %v4098_v53, %v1486_v2 }
 0x1b5   : > { %v1595_v36 = vadd.f32 %v4098_v53, %v1531_v28  ;;  %3246 = vpow2.f32 %v2955_v29 }
 0x1b6   : > { %v2942_v50 = vmul.f32 -1.442695, %v1580_v42 }
 0x1b7   : > { %v2957_v41 = vmul.f32 -1.442695, %v1595_v36  ;;  %v4104_v54 = vpop.xlane.xlu0 %1527 }
 0x1b8   : > { %v1492_v19 = vpop.xlane.xlu1 %1491  ;;  %3248 = vpow2.f32 %v2942_v50 }
 0x1b9   : > { %v1582_v60 = vadd.f32 %v4098_v53, %v1492_v19  ;;  %3250 = vpow2.f32 %v2957_v41 }
 0x1bb   : > { %v2944_v14 = vmul.f32 -1.442695, %v1582_v60  ;;  %v1534_v59 = vpop.xlane.xlu0 %1533 }
 0x1bc   : > { %v1489_v17 = vpop.xlane.xlu1 %1488  ;;  %v1596_v56 = vadd.f32 %v4098_v53, %v1534_v59 }
 0x1bd   : > { %v1581_v20 = vadd.f32 %v4098_v53, %v1489_v17  ;;  %3252 = vpow2.f32 %v2944_v14 }
 0x1be   : > { %v3245_v49 = vpop.eup %3244  ;;  %v2958_v0 = vmul.f32 -1.442695, %v1596_v56 }
 0x1bf   : > { %v3247_v48 = vpop.eup %3246  ;;  %v1707_v44 = vadd.f32 1.0, %v3245_v49  ;;  %v2943_v39 = vmul.f32 -1.442695, %v1581_v20  ;;  %v1540_v11 = vpop.xlane.xlu0 %1539 }
 0x1c0   : > { %v1537_v6 = vpop.xlane.xlu1 %1536  ;;  %v1721_v22 = vadd.f32 1.0, %v3247_v48  ;;  %3254 = vpow2.f32 %v2958_v0  ;;  %v1598_v63 = vadd.f32 %v4098_v53, %v1540_v11 }
 0x1c1   : > { %v1597_v4 = vadd.f32 %v4098_v53, %v1537_v6  ;;  %3256 = vrcp.f32 %v1707_v44 }
 0x1c2   : > { %v3249_v55 = vpop.eup %3248  ;;  %3258 = vrcp.f32 %v1721_v22  ;;  %v2960_v62 = vmul.f32 -1.442695, %v1598_v63 }
 0x1c3   : > { %v3251_v43 = vpop.eup %3250  ;;  %v1708_v7 = vadd.f32 1.0, %v3249_v55  ;;  %3260 = vpow2.f32 %v2943_v39  ;;  %v2959_v8 = vmul.f32 -1.442695, %v1597_v4  ;;  %v1543_v33 = vpop.xlane.xlu0 %1542  ;;  %v1594_v4 = vadd.f32 %v4098_v53, %v4104_v54 }
 0x1c4   : > { %v1495_v46 = vpop.xlane.xlu1 %1494  ;;  %v1723_v38 = vadd.f32 1.0, %v3251_v43  ;;  %3262 = vpow2.f32 %v2960_v62  ;;  %v1599_v52 = vadd.f32 %v4098_v53, %v1543_v33 }
 0x1c5   : > { %v1583_v3 = vadd.f32 %v4098_v53, %v1495_v46  ;;  %3264 = vrcp.f32 %v1708_v7 }
 0x1c6   : > { %3266 = vrcp.f32 %v1723_v38  ;;  %v2961_v25 = vmul.f32 -1.442695, %v1599_v52 }
 0x1c7   : > { %v3253_v30 = vpop.eup %3252  ;;  %3268 = vpow2.f32 %v2959_v8  ;;  %v2945_v10 = vmul.f32 -1.442695, %v1583_v3  ;;  %v4113_v58 = vpop.xlane.xlu0 %1545 }
 0x1c8   : > { %v1710_v29 = vadd.f32 1.0, %v3253_v30  ;;  %3270 = vpow2.f32 %v2961_v25  ;;  %v2956_v30 = vmul.f32 -1.442695, %v1594_v4 }
 0x1ca   : > { %v3255_v2 = vpop.eup %3254  ;;  %3272 = vrcp.f32 %v1710_v29 }
 0x1cb   : > { %v3257_v28 = vpop.eup %3256  ;;  %v1724_v42 = vadd.f32 1.0, %v3255_v2  ;;  %3274 = vpow2.f32 %v2945_v10  ;;  %v1498_v60 = vpop.xlane.xlu0 %1497 }
 0x1cc   : > { %v3259_v36 = vpop.eup %3258  ;;  %v4116_v50 = vmul.f32 %v3257_v28, %v4047_v12 }
 0x1cd   : > { %v3261_v41 = vpop.eup %3260  ;;  %v4119_v19 = vmul.f32 %v3259_v36, %v4094_v1  ;;  %3276 = vrcp.f32 %v1724_v42  ;;  %v1584_v1 = vadd.f32 %v4098_v53, %v1498_v60 }
 0x1ce   : > { %v3263_v14 = vpop.eup %3262  ;;  %v2063_v59 = vrot.slane %v4116_v50, 4  ;;  %v1709_v17 = vadd.f32 1.0, %v3261_v41 }
 0x1cf   : > { %v3265_v56 = vpop.eup %3264  ;;  %v2147_v20 = vrot.slane %v4119_v19, 4  ;;  %v1726_v49 = vadd.f32 1.0, %v3263_v14 }
 0x1d0   : > { %v3267_v0 = vpop.eup %3266  ;;  %v2064_v48 = vadd.f32 %v2063_v59, %v4116_v50  ;;  %v4125_v12 = vmul.f32 %v3265_v56, %v4039_v45  ;;  %3278 = vrcp.f32 %v1709_v17 }
 0x1d1   : > { %v3269_v44 = vpop.eup %3268  ;;  %v2148_v39 = vadd.f32 %v2147_v20, %v4119_v19  ;;  %v4130_v11 = vmul.f32 %v3267_v0, %v4061_v31  ;;  %3280 = vrcp.f32 %v1726_v49  ;;  %v2946_v31 = vmul.f32 -1.442695, %v1584_v1 }
 0x1d2   : > { %v3271_v6 = vpop.eup %3270  ;;  %v2065_v22 = vrot.slane %v2064_v48, 2  ;;  %v2069_v63 = vrot.slane %v4125_v12, 4  ;;  %v1725_v55 = vadd.f32 1.0, %v3269_v44 }
 0x1d3   : > { %v2149_v45 = vrot.slane %v2148_v39, 2  ;;  %v2159_v62 = vrot.slane %v4130_v11, 4  ;;  %v1727_v43 = vadd.f32 1.0, %v3271_v6 }
 0x1d4   : > { %v3273_v7 = vpop.eup %3272  ;;  %v2066_v8 = vadd.f32 %v2065_v22, %v2064_v48  ;;  %v2070_v33 = vadd.f32 %v2069_v63, %v4125_v12  ;;  %3282 = vrcp.f32 %v1725_v55 }
 0x1d5   : > { %v3275_v46 = vpop.eup %3274  ;;  %v2150_v38 = vadd.f32 %v2149_v45, %v2148_v39  ;;  %v2160_v52 = vadd.f32 %v2159_v62, %v4130_v11  ;;  %v4139_v3 = vmul.f32 %v3273_v7, %v4055_v27  ;;  %3284 = vrcp.f32 %v1727_v43 }
 0x1d6   : > { %v2067_v54 = vrot.slane %v2066_v8, 1  ;;  %v2071_v25 = vrot.slane %v2070_v33, 2  ;;  %v1711_v10 = vadd.f32 1.0, %v3275_v46 }
 0x1d7   : > { %v3277_v29 = vpop.eup %3276  ;;  %v2151_v2 = vrot.slane %v2150_v38, 1  ;;  %v2161_v28 = vrot.slane %v2160_v52, 2  ;;  %v2081_v42 = vrot.slane %v4139_v3, 4 }
 0x1d8   : > { %v2068_v36 = vadd.f32 %v2067_v54, %v2066_v8  ;;  %v2072_v41 = vadd.f32 %v2071_v25, %v2070_v33  ;;  %v4143_v60 = vmul.f32 %v3277_v29, %v4068_v21  ;;  %3286 = vrcp.f32 %v1711_v10 }
 0x1d9   : > { %v2152_v14 = vadd.f32 %v2151_v2, %v2150_v38  ;;  %v2162_v59 = vadd.f32 %v2161_v28, %v2160_v52  ;;  %v2082_v27 = vadd.f32 %v2081_v42, %v4139_v3  ;;  %3288 = vpow2.f32 %v2946_v31  ;;  %v1552_v38 = vpop.xlane.xlu1 %1551 }
 0x1da   : > { %v3279_v17 = vpop.eup %3278  ;;  %v2255_v56 = vadd.f32 1e-08, %v2068_v36  ;;  %v2073_v20 = vrot.slane %v2072_v41, 1  ;;  %3290 = vpow2.f32 %v2956_v30  ;;  %v2165_v49 = vrot.slane %v4143_v60, 4 }
 0x1db   : > { %v3281_v0 = vpop.eup %3280  ;;  %v2269_v48 = vadd.f32 1e-08, %v2152_v14  ;;  %v2163_v1 = vrot.slane %v2162_v59, 1  ;;  %v2083_v44 = vrot.slane %v2082_v27, 2  ;;  %v4148_v39 = vmul.f32 %v3279_v17, %v4041_v40 }
 0x1dc   : > { %3292 = vrcp.f32 %v2255_v56  ;;  %v2074_v21 = vadd.f32 %v2073_v20, %v2072_v41  ;;  %v2166_v6 = vadd.f32 %v2165_v49, %v4143_v60  ;;  %v4152_v22 = vmul.f32 %v3281_v0, %v4084_v15 }
 0x1dd   : > { %3294 = vrcp.f32 %v2269_v48  ;;  %v2164_v63 = vadd.f32 %v2163_v1, %v2162_v59  ;;  %v2084_v4 = vadd.f32 %v2083_v44, %v2082_v27  ;;  %v2075_v55 = vrot.slane %v4148_v39, 4 }
 0x1de   : > { %v3283_v45 = vpop.eup %3282  ;;  %v4155_v62 = vadd.f32 1e-08, %v2074_v21  ;;  %v2167_v43 = vrot.slane %v2166_v6, 2  ;;  %v2177_v7 = vrot.slane %v4152_v22, 4  ;;  %v1600_v40 = vadd.f32 %v4098_v53, %v4113_v58 }
 0x1df   : > { %v3285_v8 = vpop.eup %3284  ;;  %v4160_v33 = vadd.f32 1e-08, %v2164_v63  ;;  %v2085_v31 = vrot.slane %v2084_v4, 1  ;;  %v2076_v15 = vadd.f32 %v2075_v55, %v4148_v39  ;;  %v4164_v46 = vmul.f32 %v3283_v45, %v4070_v5 }
 0x1e0   : > { %3296 = vrcp.f32 %v4155_v62  ;;  %v2168_v52 = vadd.f32 %v2167_v43, %v2166_v6  ;;  %v2178_v54 = vadd.f32 %v2177_v7, %v4152_v22  ;;  %v4169_v25 = vmul.f32 %v3285_v8, %v4092_v57 }
 0x1e1   : > { %3298 = vrcp.f32 %v4160_v33  ;;  %v2086_v58 = vadd.f32 %v2085_v31, %v2084_v4  ;;  %v2077_v30 = vrot.slane %v2076_v15, 2  ;;  %v2171_v10 = vrot.slane %v4164_v46, 4 }
 0x1e2   : > { %v3287_v29 = vpop.eup %3286  ;;  %v2169_v2 = vrot.slane %v2168_v52, 1  ;;  %v2179_v28 = vrot.slane %v2178_v54, 2  ;;  %v2183_v5 = vrot.slane %v4169_v25, 4  ;;  %v1602_v42 = vadd.f32 %v4098_v53, %v1552_v38 }
 0x1e3   : > { %v3289_v36 = vpop.eup %3288  ;;  %v4175_v41 = vadd.f32 1e-08, %v2086_v58  ;;  %v2078_v14 = vadd.f32 %v2077_v30, %v2076_v15  ;;  %v2172_v57 = vadd.f32 %v2171_v10, %v4164_v46  ;;  %v4179_v59 = vmul.f32 %v3287_v29, %v4066_v24  ;;  %v1549_v15 = vpop.xlane.xlu1 %1548 }
 0x1e4   : > { %v4181_v27 = vpop.eup %3290  ;;  %v2170_v17 = vadd.f32 %v2169_v2, %v2168_v52  ;;  %v2180_v20 = vadd.f32 %v2179_v28, %v2178_v54  ;;  %v2184_v49 = vadd.f32 %v2183_v5, %v4169_v25  ;;  %v2962_v0 = vmul.f32 -1.442695, %v1600_v40  ;;  %v1504_v29 = vpop.xlane.xlu0 %1503 }
 0x1e5   : > { %3300 = vrcp.f32 %v4175_v41  ;;  %v2079_v1 = vrot.slane %v2078_v14, 1  ;;  %v2173_v44 = vrot.slane %v2172_v57, 2  ;;  %v2087_v21 = vrot.slane %v4179_v59, 4 }
 0x1e6   : > { %v3293_v6 = vpop.eup %3292  ;;  %v2272_v63 = vadd.f32 1e-08, %v2170_v17  ;;  %v2181_v4 = vrot.slane %v2180_v20, 1  ;;  %v2185_v55 = vrot.slane %v2184_v49, 2  ;;  %v1712_v45 = vadd.f32 1.0, %v3289_v36 }
 0x1e7   : > { %v3295_v24 = vpop.eup %3294  ;;  %v2319_v43 = vmul.f32 %v3293_v6, %v2255_v56  ;;  %v2080_v7 = vadd.f32 %v2079_v1, %v2078_v14  ;;  %v2174_v8 = vadd.f32 %v2173_v44, %v2172_v57  ;;  %v2088_v31 = vadd.f32 %v2087_v21, %v4179_v59 }
 0x1e8   : > { %v2333_v38 = vmul.f32 %v3295_v24, %v2269_v48  ;;  %3302 = vrcp.f32 %v2272_v63  ;;  %v2182_v40 = vadd.f32 %v2181_v4, %v2180_v20  ;;  %v2186_v52 = vadd.f32 %v2185_v55, %v2184_v49 }
 0x1e9   : > { %v2351_v54 = vsub.f32 2.0, %v2319_v43  ;;  %v2257_v58 = vadd.f32 1e-08, %v2080_v7  ;;  %v2175_v30 = vrot.slane %v2174_v8, 1  ;;  %v2089_v10 = vrot.slane %v2088_v31, 2 }
 0x1ea   : > { %v3297_v2 = vpop.eup %3296  ;;  %v4187_v28 = vadd.f32 1e-08, %v2182_v40  ;;  %v2187_v5 = vrot.slane %v2186_v52, 1  ;;  %3304 = vrcp.f32 %v1712_v45  ;;  %v1601_v56 = vadd.f32 %v4098_v53, %v1549_v15 }
 0x1eb   : > { %v3299_v36 = vpop.eup %3298  ;;  %v2383_v14 = vmul.f32 %v3293_v6, %v2351_v54  ;;  %v2320_v57 = vmul.f32 %v3297_v2, %v4155_v62  ;;  %3306 = vrcp.f32 %v2257_v58  ;;  %v2176_v48 = vadd.f32 %v2175_v30, %v2174_v8 }
 0x1ec   : > { %v2365_v17 = vsub.f32 2.0, %v2333_v38  ;;  %v2335_v20 = vmul.f32 %v3299_v36, %v4160_v33  ;;  %v2964_v49 = vmul.f32 -1.442695, %v1602_v42  ;;  %v1586_v1 = vadd.f32 %v4098_v53, %v1504_v29  ;;  %v1558_v29 = vpop.xlane.xlu1 %1557 }
 0x1ed   : > { %v2352_v44 = vsub.f32 2.0, %v2320_v57  ;;  %3308 = vrcp.f32 %v4187_v28  ;;  %v2273_v21 = vadd.f32 1e-08, %v2176_v48  ;;  %v2090_v4 = vadd.f32 %v2089_v10, %v2088_v31  ;;  %v3439_v31 = vld [vmem:[%s3578_s14] sm:$0xff] }
 0x1ee   : > { %3310 = vpow2.f32 %v2962_v0  ;;  %v2963_v55 = vmul.f32 -1.442695, %v1601_v56  ;;  %v2415_v6 = vmul.f32 %v2383_v14, %v4116_v50  ;;  %v2188_v62 = vadd.f32 %v2187_v5, %v2186_v52 }
 0x1ef   : > { %v3301_v45 = vpop.eup %3300  ;;  %3312 = vrcp.f32 %v2273_v21  ;;  %v2091_v43 = vrot.slane %v2090_v4, 1  ;;  %v2367_v7 = vsub.f32 2.0, %v2335_v20  ;;  %v2948_v33 = vmul.f32 -1.442695, %v1586_v1  ;;  %v3441_v1 = vld [vmem:[%s3578_s14 + $0x8] sm:$0xff] }
 0x1f0   : > { %3314 = vpow2.f32 %v2964_v49  ;;  %v2397_v42 = vmul.f32 %v3295_v24, %v2365_v17  ;;  %v2384_v8 = vmul.f32 %v3297_v2, %v2352_v44  ;;  %v2322_v15 = vmul.f32 %v3301_v45, %v4175_v41 }
 0x1f1   : > { %v2092_v38 = vadd.f32 %v2091_v43, %v2090_v4  ;;  %3316 = vpow2.f32 %v2963_v55  ;;  %v2447_v0 = vmul.f32 %v3439_v31, %v2415_v6  ;;  %v4197_v30 = vadd.f32 1e-08, %v2188_v62  ;;  %v4212_v55 = vpop.xlane.xlu0 %1500 }
 0x1f2   : > { %v3303_v40 = vpop.eup %3302  ;;  %v2399_v52 = vmul.f32 %v3299_v36, %v2367_v7  ;;  %3318 = vpow2.f32 %v2948_v33  ;;  %v2429_v24 = vmul.f32 %v2397_v42, %v4119_v19  ;;  %v2416_v41 = vmul.f32 %v2384_v8, %v4125_v12  ;;  %v3440_v12 = vld [vmem:[%s3578_s14 + $0x70] sm:$0xff]  ;;  %v3442_v42 = vld [vmem:[%s3578_s14 + $0x80] sm:$0xff] }
 0x1f3   : > { %v2336_v54 = vmul.f32 %v3303_v40, %v2272_v63  ;;  %v4199_v10 = vadd.f32 1e-08, %v2092_v38  ;;  %v2354_v2 = vsub.f32 2.0, %v2322_v15  ;;  %v2479_v14 = vsel %vm503_vm1, %v2447_v0, 0.0 }
 0x1f4   : > { %v3305_v50 = vpop.eup %3304  ;;  %v2431_v17 = vmul.f32 %v2399_v52, %v4130_v11  ;;  %v2461_v49 = vmul.f32 %v3440_v12, %v2429_v24  ;;  %v2448_v44 = vmul.f32 %v3441_v1, %v2416_v41  ;;  %v2480_v62 = vrot.slane %v2479_v14, 4  ;;  %v4216_v11 = vpop.xlane.xlu1 %1506 }
 0x1f5   : > { %v3307_v5 = vpop.eup %3306  ;;  %v2368_v56 = vsub.f32 2.0, %v2336_v54  ;;  %3320 = vrcp.f32 %v4199_v10  ;;  %v4208_v20 = vmul.f32 %v3305_v50, %v4080_v47  ;;  %v2386_v4 = vmul.f32 %v3301_v45, %v2354_v2  ;;  %v4225_v24 = vpop.xlane.xlu0 %1554 }
 0x1f6   : > { %v2321_v48 = vmul.f32 %v3307_v5, %v2257_v58  ;;  %3322 = vrcp.f32 %v4197_v30  ;;  %v1722_v47 = vadd.f32 1.0, %v4181_v27  ;;  %v2463_v8 = vmul.f32 %v3442_v42, %v2431_v17  ;;  %v3444_v17 = vld [vmem:[%s3578_s14 + $0x18] sm:$0xff] }
 0x1f7   : > { %v3309_v63 = vpop.eup %3308  ;;  %v2400_v57 = vmul.f32 %v3303_v40, %v2368_v56  ;;  %v2093_v45 = vrot.slane %v4208_v20, 4  ;;  %v2577_v38 = vsel %vm503_vm1, %v2461_v49, 0.0  ;;  %v2486_v40 = vsel %vm503_vm1, %v2448_v44, 0.0 }
 0x1f8   : > { %v3311_v36 = vpop.eup %3310  ;;  %v2338_v43 = vmul.f32 %v3309_v63, %v4187_v28  ;;  %v2353_v7 = vsub.f32 2.0, %v2321_v48  ;;  %v2418_v31 = vmul.f32 %v2386_v4, %v4139_v3  ;;  %v2481_v0 = vadd.f32 %v2480_v62, %v2479_v14  ;;  %v3443_v28 = vld [vmem:[%s3578_s14 + $0x88] sm:$0xff]  ;;  %v4230_v3 = vpop.xlane.xlu1 %1563 }
 0x1f9   : > { %v3313_v19 = vpop.eup %3312  ;;  %v2432_v58 = vmul.f32 %v2400_v57, %v4143_v60  ;;  %3324 = vrcp.f32 %v1722_v47  ;;  %v2487_v41 = vrot.slane %v2486_v40, 4  ;;  %v2591_v2 = vsel %vm503_vm1, %v2463_v8, 0.0 }
 0x1fa   : > { %v3315_v6 = vpop.eup %3314  ;;  %v2337_v15 = vmul.f32 %v3313_v19, %v2273_v21  ;;  %v2370_v50 = vsub.f32 2.0, %v2338_v43  ;;  %v2385_v52 = vmul.f32 %v3307_v5, %v2353_v7  ;;  %v2094_v56 = vadd.f32 %v2093_v45, %v4208_v20 }
 0x1fb   : > { %v3317_v33 = vpop.eup %3316  ;;  %v2464_v54 = vmul.f32 %v3443_v28, %v2432_v58  ;;  %v1604_v57 = vadd.f32 %v4098_v53, %v1558_v29  ;;  %v2578_v48 = vrot.slane %v2577_v38, 4  ;;  %v2450_v12 = vmul.f32 %v3444_v17, %v2418_v31 }
 0x1fc   : > { %v3319_v60 = vpop.eup %3318  ;;  %v2369_v27 = vsub.f32 2.0, %v2337_v15  ;;  %v1728_v49 = vadd.f32 1.0, %v3311_v36  ;;  %v1730_v1 = vadd.f32 1.0, %v3315_v6  ;;  %v2482_v44 = vrot.slane %v2481_v0, 2 }
 0x1fd   : > { %v2598_v5 = vsel %vm503_vm1, %v2464_v54, 0.0  ;;  %v2402_v4 = vmul.f32 %v3309_v63, %v2370_v50  ;;  %v2592_v58 = vrot.slane %v2591_v2, 4  ;;  %v2417_v43 = vmul.f32 %v2385_v52, %v4148_v39  ;;  %v1510_v63 = vpop.xlane.xlu0 %1509 }
 0x1fe   : > { %v2401_v62 = vmul.f32 %v3313_v19, %v2369_v27  ;;  %v1729_v7 = vadd.f32 1.0, %v3317_v33  ;;  %v2488_v29 = vadd.f32 %v2487_v41, %v2486_v40  ;;  %v2095_v8 = vrot.slane %v2094_v56, 2  ;;  %v1561_v33 = vpop.xlane.xlu1 %1560  ;;  %v3446_v41 = vld [vmem:[%s3578_s14 + $0x98] sm:$0xff] }
 0x1ff   : > { %v3321_v21 = vpop.eup %3320  ;;  %v1714_v15 = vadd.f32 1.0, %v3319_v60  ;;  %v4237_v45 = vadd.f32 %v2578_v48, %v2577_v38  ;;  %v2500_v36 = vsel %vm503_vm1, %v2450_v12, 0.0  ;;  %v2599_v6 = vrot.slane %v2598_v5, 4  ;;  %v3447_v48 = vld [vmem:[%s3578_s14 + $0x90] sm:$0xff] }
 0x200   : > { %v3323_v14 = vpop.eup %3322  ;;  %v2323_v47 = vmul.f32 %v3321_v21, %v4199_v10  ;;  %v4240_v19 = vadd.f32 %v2482_v44, %v2481_v0  ;;  %v2434_v39 = vmul.f32 %v2402_v4, %v4152_v22  ;;  %v2433_v10 = vmul.f32 %v2401_v62, %v4164_v46 }
 0x201   : > { %v2339_v42 = vmul.f32 %v3323_v14, %v4197_v30  ;;  %3326 = vrcp.f32 %v1728_v49  ;;  %v4244_v40 = vadd.f32 %v2592_v58, %v2591_v2  ;;  %v3445_v30 = vld [vmem:[%s3578_s14 + $0x10] sm:$0xff]  ;;  %v2096_v60 = vadd.f32 %v2095_v8, %v2094_v56  ;;  %v1516_v4 = vpop.xlane.xlu0 %1515 }
 0x202   : > { %v2355_v31 = vsub.f32 2.0, %v2323_v47  ;;  %v2449_v38 = vmul.f32 %v3445_v30, %v2417_v43  ;;  %3328 = vrcp.f32 %v1730_v1  ;;  %v2489_v28 = vrot.slane %v2488_v29, 2  ;;  %v4263_v58 = vpop.xlane.xlu1 %1566  ;;  %v3448_v30 = vld [vmem:[%s3578_s14 + $0x20] sm:$0xff] }
 0x203   : > { %v2501_v54 = vrot.slane %v2500_v36, 4  ;;  %v2371_v50 = vsub.f32 2.0, %v2339_v42  ;;  %3330 = vrcp.f32 %v1714_v15  ;;  %v4247_v0 = vpop.eup %3324  ;;  %v4250_v27 = vadd.f32 %v2599_v6, %v2598_v5 }
 0x204   : > { %v2387_v46 = vmul.f32 %v3321_v21, %v2355_v31  ;;  %3332 = vrcp.f32 %v1729_v7  ;;  %v2484_v52 = vrot.slane %v4240_v19, 1  ;;  %v2466_v2 = vmul.f32 %v3446_v41, %v2434_v39 }
 0x205   : > { %v2465_v17 = vmul.f32 %v3447_v48, %v2433_v10  ;;  %v2966_v12 = vmul.f32 -1.442695, %v1604_v57  ;;  %v2594_v56 = vrot.slane %v4244_v40, 2  ;;  %v2493_v49 = vsel %vm503_vm1, %v2449_v38, 0.0 }
 0x206   : > { %v2097_v1 = vrot.slane %v2096_v60, 1  ;;  %v1585_v44 = vadd.f32 %v4098_v53, %v4212_v55  ;;  %v4259_v5 = vadd.f32 %v2489_v28, %v2488_v29  ;;  %v4261_v21 = vadd.f32 %v2501_v54, %v2500_v36  ;;  %v1513_v28 = vpop.xlane.xlu0 %1512 }
 0x207   : > { %v2403_v62 = vmul.f32 %v3323_v14, %v2371_v50  ;;  %3334 = vpow2.f32 %v2966_v12  ;;  %v2601_v43 = vrot.slane %v4250_v27, 2  ;;  %v2419_v57 = vmul.f32 %v2387_v46, %v4179_v59 }
 0x208   : > { %v2947_v47 = vmul.f32 -1.442695, %v1585_v44  ;;  %v1587_v7 = vadd.f32 %v4098_v53, %v4216_v11  ;;  %v2494_v42 = vrot.slane %v2493_v49, 4  ;;  %v2612_v55 = vsel %vm503_vm1, %v2466_v2, 0.0 }
 0x209   : > { %v2605_v29 = vsel %vm503_vm1, %v2465_v17, 0.0  ;;  %v1603_v14 = vadd.f32 %v4098_v53, %v4225_v24  ;;  %v2098_v8 = vadd.f32 %v2097_v1, %v2096_v60  ;;  %v1606_v36 = vadd.f32 %v4098_v53, %v4230_v3 }
 0x20a   : > { %3336 = vpow2.f32 %v2947_v47  ;;  %v2949_v15 = vmul.f32 -1.442695, %v1587_v7  ;;  %v2435_v6 = vmul.f32 %v2403_v62, %v4169_v25  ;;  %v1588_v11 = vadd.f32 %v4098_v53, %v1510_v63  ;;  %v1522_v25 = vpop.xlane.xlu1 %1521  ;;  %v3449_v7 = vld [vmem:[%s3578_s14 + $0xa0] sm:$0xff] }
 0x20b   : > { %v4275_v59 = vpop.eup %3326  ;;  %v2965_v31 = vmul.f32 -1.442695, %v1603_v14  ;;  %v1605_v39 = vadd.f32 %v4098_v53, %v1561_v33  ;;  %v2451_v38 = vmul.f32 %v3448_v30, %v2419_v57  ;;  %v2968_v24 = vmul.f32 -1.442695, %v1606_v36 }
 0x20c   : > { %v4280_v10 = vpop.eup %3328  ;;  %3338 = vpow2.f32 %v2949_v15  ;;  %v1590_v60 = vadd.f32 %v4098_v53, %v1516_v4  ;;  %v2606_v3 = vrot.slane %v2605_v29, 4  ;;  %v2950_v50 = vmul.f32 -1.442695, %v1588_v11 }
 0x20d   : > { %v3331_v54 = vpop.eup %3330  ;;  %3340 = vpow2.f32 %v2965_v31  ;;  %v2967_v46 = vmul.f32 -1.442695, %v1605_v39  ;;  %v2503_v63 = vrot.slane %v4261_v21, 2  ;;  %v4287_v33 = vadd.f32 1e-08, %v2098_v8 }
 0x20e   : > { %v4284_v41 = vpop.eup %3332  ;;  %v4290_v2 = vmul.f32 %v3331_v54, %v4096_v37  ;;  %3342 = vpow2.f32 %v2968_v24  ;;  %v2613_v48 = vrot.slane %v2612_v55, 4  ;;  %v2952_v17 = vmul.f32 -1.442695, %v1590_v60  ;;  %v1519_v24 = vpop.xlane.xlu1 %1518 }
 0x20f   : > { %3344 = vpow2.f32 %v2950_v50  ;;  %v1589_v12 = vadd.f32 %v4098_v53, %v1513_v28  ;;  %v2507_v1 = vsel %vm503_vm1, %v2451_v38, 0.0  ;;  %v1592_v4 = vadd.f32 %v4098_v53, %v1522_v25 }
 0x210   : > { %v2105_v44 = vrot.slane %v4290_v2, 4  ;;  %3346 = vpow2.f32 %v2967_v46  ;;  %v4297_v57 = vadd.f32 %v2601_v43, %v4250_v27  ;;  %v2495_v47 = vadd.f32 %v2494_v42, %v2493_v49 }
 0x211   : > { %v3335_v62 = vpop.eup %3334  ;;  %v2607_v37 = vadd.f32 %v2606_v3, %v2605_v29  ;;  %v2467_v14 = vmul.f32 %v3449_v7, %v2435_v6  ;;  %3348 = vrcp.f32 %v4287_v33  ;;  %v2951_v36 = vmul.f32 -1.442695, %v1589_v12 }
 0x212   : > { %v2106_v8 = vadd.f32 %v2105_v44, %v4290_v2  ;;  %v1732_v15 = vadd.f32 1.0, %v3335_v62  ;;  %v2595_v31 = vadd.f32 %v2594_v56, %v4244_v40  ;;  %v2614_v11 = vadd.f32 %v2613_v48, %v2612_v55 }
 0x213   : > { %v2508_v39 = vrot.slane %v2507_v1, 4  ;;  %3350 = vpow2.f32 %v2952_v17  ;;  %v2491_v27 = vrot.slane %v4259_v5, 1  ;;  %v2954_v43 = vmul.f32 -1.442695, %v1592_v4 }
 0x214   : > { %v3337_v30 = vpop.eup %3336  ;;  %v2107_v49 = vrot.slane %v2106_v8, 2  ;;  %3352 = vrcp.f32 %v1732_v15  ;;  %v2504_v42 = vadd.f32 %v2503_v63, %v4261_v21  ;;  %v2603_v29 = vrot.slane %v4297_v57, 1 }
 0x215   : > { %v2496_v6 = vrot.slane %v2495_v47, 2  ;;  %v1713_v38 = vadd.f32 1.0, %v3337_v30  ;;  %v2608_v28 = vrot.slane %v2607_v37, 2  ;;  %v2619_v40 = vsel %vm503_vm1, %v2467_v14, 0.0 }
 0x216   : > { %v3339_v60 = vpop.eup %3338  ;;  %v2108_v56 = vadd.f32 %v2107_v49, %v2106_v8  ;;  %3354 = vpow2.f32 %v2951_v36  ;;  %v2615_v54 = vrot.slane %v2614_v11, 2  ;;  %v2509_v3 = vadd.f32 %v2508_v39, %v2507_v1 }
 0x217   : > { %v3341_v55 = vpop.eup %3340  ;;  %3356 = vrcp.f32 %v1713_v38  ;;  %v1715_v50 = vadd.f32 1.0, %v3339_v60  ;;  %v1591_v21 = vadd.f32 %v4098_v53, %v1519_v24  ;;  %v2497_v17 = vadd.f32 %v2496_v6, %v2495_v47  ;;  %v1570_v38 = vpop.xlane.xlu0 %1569 }
 0x218   : > { %v3343_v46 = vpop.eup %3342  ;;  %v2109_v25 = vrot.slane %v2108_v56, 1  ;;  %v1731_v48 = vadd.f32 1.0, %v3341_v55  ;;  %3358 = vpow2.f32 %v2954_v43  ;;  %v2620_v12 = vrot.slane %v2619_v40, 4 }
 0x219   : > { %v3345_v63 = vpop.eup %3344  ;;  %3360 = vrcp.f32 %v1715_v50  ;;  %v1734_v44 = vadd.f32 1.0, %v3343_v46  ;;  %v2609_v62 = vadd.f32 %v2608_v28, %v2607_v37  ;;  %v2596_v1 = vrot.slane %v2595_v31, 1 }
 0x21a   : > { %v3347_v4 = vpop.eup %3346  ;;  %v2110_v7 = vadd.f32 %v2109_v25, %v2108_v56  ;;  %3362 = vrcp.f32 %v1731_v48  ;;  %v1716_v14 = vadd.f32 1.0, %v3345_v63  ;;  %v2505_v8 = vrot.slane %v2504_v42, 1 }
 0x21b   : > { %3364 = vrcp.f32 %v1734_v44  ;;  %v1733_v15 = vadd.f32 1.0, %v3347_v4  ;;  %v4310_v36 = vpop.eup %3348  ;;  %v2510_v39 = vrot.slane %v2509_v3, 2  ;;  %v2953_v47 = vmul.f32 -1.442695, %v1591_v21 }
 0x21c   : > { %v4312_v30 = vadd.f32 1e-08, %v2110_v7  ;;  %3366 = vrcp.f32 %v1716_v14  ;;  %v4317_v43 = vadd.f32 %v2484_v52, %v4240_v19  ;;  %v2498_v37 = vrot.slane %v2497_v17, 1 }
 0x21d   : > { %v3351_v49 = vpop.eup %3350  ;;  %v4319_v6 = vadd.f32 %v2615_v54, %v2614_v11  ;;  %3368 = vrcp.f32 %v1733_v15  ;;  %v2604_v60 = vadd.f32 %v2603_v29, %v4297_v57  ;;  %v2610_v28 = vrot.slane %v2609_v62, 1 }
 0x21e   : > { %v3353_v24 = vpop.eup %3352  ;;  %v4322_v56 = vadd.f32 %v2620_v12, %v2619_v40  ;;  %3370 = vrcp.f32 %v4312_v30  ;;  %v4326_v55 = vadd.f32 %v2491_v27, %v4259_v5  ;;  %v2597_v50 = vadd.f32 %v2596_v1, %v2595_v31  ;;  %v1573_v12 = vpop.xlane.xlu0 %1572 }
 0x21f   : > { %v4329_v19 = vmul.f32 %v3353_v24, %v4074_v26  ;;  %v1607_v52 = vadd.f32 %v4098_v53, %v4263_v58  ;;  %v4333_v54 = vadd.f32 %v2505_v8, %v2504_v42  ;;  %v4335_v46 = vadd.f32 %v2510_v39, %v2509_v3 }
 0x220   : > { %v3355_v11 = vpop.eup %3354  ;;  %v1718_v57 = vadd.f32 1.0, %v3351_v49  ;;  %3372 = vpow2.f32 %v2953_v47  ;;  %v4337_v40 = vadd.f32 %v2498_v37, %v2497_v17  ;;  %v2324_v31 = vmul.f32 %v4310_v36, %v4287_v33 }
 0x221   : > { %v3357_v29 = vpop.eup %3356  ;;  %v2213_v26 = vrot.slane %v4329_v19, 4  ;;  %v4343_v25 = vadd.f32 %v2610_v28, %v2609_v62  ;;  %v4350_v3 = vsel %vm2735_vm3, %v2604_v60, %v2597_v50  ;;  %v4353_v63 = vmul.f32 -1.442695, %v1607_v52 }
 0x222   : > { %v3359_v27 = vpop.eup %3358  ;;  %v4347_v42 = vmul.f32 %v3357_v29, %v4088_v35  ;;  %v1717_v17 = vadd.f32 1.0, %v3355_v11  ;;  %v4356_v33 = vadd.f32 %v4098_v53, %v1570_v38  ;;  %v2512_v4 = vrot.slane %v4335_v46, 1 }
 0x223   : > { %v3361_v48 = vpop.eup %3360  ;;  %v2214_v21 = vadd.f32 %v2213_v26, %v4329_v19  ;;  %3374 = vrcp.f32 %v1718_v57  ;;  %v2356_v14 = vsub.f32 2.0, %v2324_v31  ;;  %v1720_v15 = vadd.f32 1.0, %v3359_v27 }
 0x224   : > { %v3363_v44 = vpop.eup %3362  ;;  %v2099_v62 = vrot.slane %v4347_v42, 4  ;;  %v4361_v35 = vmul.f32 %v3361_v48, %v4045_v9  ;;  %v4372_v38 = vadd.f32 %v4098_v53, %v1573_v12  ;;  %3376 = vrcp.f32 %v1717_v17 }
 0x225   : > { %v3365_v7 = vpop.eup %3364  ;;  %v2215_v1 = vrot.slane %v2214_v21, 2  ;;  %v4364_v8 = vmul.f32 %v3363_v44, %v4076_v61  ;;  %v2388_v57 = vmul.f32 %v4310_v36, %v2356_v14  ;;  %3378 = vrcp.f32 %v1720_v15 }
 0x226   : > { %v3367_v39 = vpop.eup %3366  ;;  %v2100_v47 = vadd.f32 %v2099_v62, %v4347_v42  ;;  %v2111_v49 = vrot.slane %v4361_v35, 4  ;;  %v4369_v37 = vmul.f32 %v3365_v7, %v4090_v13 }
 0x227   : > { %v3369_v9 = vpop.eup %3368  ;;  %v2216_v24 = vadd.f32 %v2215_v1, %v2214_v21  ;;  %v2207_v60 = vrot.slane %v4364_v8, 4  ;;  %v4376_v28 = vmul.f32 %v3367_v39, %v4057_v51 }
 0x228   : > { %v3371_v61 = vpop.eup %3370  ;;  %v2101_v50 = vrot.slane %v2100_v47, 2  ;;  %v2112_v52 = vadd.f32 %v2111_v49, %v4361_v35  ;;  %v2225_v11 = vrot.slane %v4369_v37, 4  ;;  %v4381_v13 = vmul.f32 %v3369_v9, %v4082_v16 }
 0x229   : > { %v2217_v29 = vrot.slane %v2216_v24, 1  ;;  %v2208_v31 = vadd.f32 %v2207_v60, %v4364_v8  ;;  %v2117_v21 = vrot.slane %v4376_v28, 4  ;;  %v2326_v17 = vmul.f32 %v3371_v61, %v4312_v30 }
 0x22a   : > { %v3373_v26 = vpop.eup %3372  ;;  %v2102_v27 = vadd.f32 %v2101_v50, %v2100_v47  ;;  %v2113_v51 = vrot.slane %v2112_v52, 2  ;;  %v2226_v48 = vadd.f32 %v2225_v11, %v4369_v37  ;;  %v2219_v16 = vrot.slane %v4381_v13, 4 }
 0x22b   : > { %v2218_v12 = vadd.f32 %v2217_v29, %v2216_v24  ;;  %v2209_v44 = vrot.slane %v2208_v31, 2  ;;  %v2118_v14 = vadd.f32 %v2117_v21, %v4376_v28  ;;  %v1719_v47 = vadd.f32 1.0, %v3373_v26 }
 0x22c   : > { %v2103_v62 = vrot.slane %v2102_v27, 1  ;;  %v2114_v7 = vadd.f32 %v2113_v51, %v2112_v52  ;;  %v2227_v36 = vrot.slane %v2226_v48, 2  ;;  %v2220_v39 = vadd.f32 %v2219_v16, %v4381_v13 }
 0x22d   : > { %v2280_v1 = vadd.f32 1e-08, %v2218_v12  ;;  %v2210_v15 = vadd.f32 %v2209_v44, %v2208_v31  ;;  %v3375_v49 = vpop.eup %3374  ;;  %v2119_v11 = vrot.slane %v2118_v14, 2  ;;  %v2358_v30 = vsub.f32 2.0, %v2326_v17 }
 0x22e   : > { %v2104_v9 = vadd.f32 %v2103_v62, %v2102_v27  ;;  %v2115_v60 = vrot.slane %v2114_v7, 1  ;;  %v2228_v50 = vadd.f32 %v2227_v36, %v2226_v48  ;;  %v2221_v29 = vrot.slane %v2220_v39, 2  ;;  %v3377_v58 = vpop.eup %3376 }
 0x22f   : > { %3380 = vrcp.f32 %v2280_v1  ;;  %v2211_v24 = vrot.slane %v2210_v15, 1  ;;  %v2120_v51 = vadd.f32 %v2119_v11, %v2118_v14  ;;  %v2420_v21 = vmul.f32 %v2388_v57, %v4208_v20  ;;  %v3379_v17 = vpop.eup %3378 }
 0x230   : > { %v2261_v22 = vadd.f32 1e-08, %v2104_v9  ;;  %v2116_v5 = vadd.f32 %v2115_v60, %v2114_v7  ;;  %v2229_v52 = vrot.slane %v2228_v50, 1  ;;  %v2222_v12 = vadd.f32 %v2221_v29, %v2220_v39  ;;  %v3450_v9 = vld [vmem:[%s3578_s14 + $0x28] sm:$0xff] }
 0x231   : > { %v2212_v31 = vadd.f32 %v2211_v24, %v2210_v15  ;;  %v4393_v26 = vmul.f32 %v3375_v49, %v4072_v32  ;;  %v2121_v44 = vrot.slane %v2120_v51, 1  ;;  %v2390_v7 = vmul.f32 %v3371_v61, %v2358_v30  ;;  %v1576_v15 = vpop.xlane.xlu1 %1575 }
 0x232   : > { %3382 = vrcp.f32 %v2261_v22  ;;  %v2263_v27 = vadd.f32 1e-08, %v2116_v5  ;;  %v2230_v48 = vadd.f32 %v2229_v52, %v2228_v50  ;;  %v2223_v62 = vrot.slane %v2222_v12, 1 }
 0x233   : > { %v2279_v16 = vadd.f32 1e-08, %v2212_v31  ;;  %v2129_v36 = vrot.slane %v4393_v26, 4  ;;  %3384 = vrcp.f32 %v1719_v47  ;;  %v2122_v20 = vadd.f32 %v2121_v44, %v2120_v51 }
 0x234   : > { %3386 = vrcp.f32 %v2263_v27  ;;  %v4396_v14 = vadd.f32 1e-08, %v2230_v48  ;;  %v2224_v57 = vadd.f32 %v2223_v62, %v2222_v12  ;;  %v4400_v5 = vmul.f32 %v3377_v58, %v4063_v34  ;;  %v3451_v12 = vld [vmem:[%s3578_s14 + $0x38] sm:$0xff] }
 0x235   : > { %3388 = vrcp.f32 %v2279_v16  ;;  %v2130_v32 = vadd.f32 %v2129_v36, %v4393_v26  ;;  %v4402_v39 = vadd.f32 1e-08, %v2122_v20  ;;  %v4406_v49 = vmul.f32 %v3379_v17, %v4086_v18 }
 0x236   : > { %3390 = vpow2.f32 %v4353_v63  ;;  %v2970_v61 = vmul.f32 -1.442695, %v4356_v33  ;;  %v4412_v47 = vadd.f32 %v2512_v4, %v4335_v46  ;;  %v2452_v60 = vmul.f32 %v3450_v9, %v2420_v21 }
 0x237   : > { %v2131_v50 = vrot.slane %v2130_v32, 2  ;;  %v2123_v34 = vrot.slane %v4400_v5, 4  ;;  %v2422_v58 = vmul.f32 %v2390_v7, %v4290_v2  ;;  %3392 = vrcp.f32 %v4396_v14 }
 0x238   : > { %v2141_v63 = vrot.slane %v4406_v49, 4  ;;  %v1610_v18 = vadd.f32 %v4098_v53, %v1576_v15  ;;  %v4420_v11 = vadd.f32 1e-08, %v2224_v57  ;;  %v2971_v4 = vmul.f32 -1.442695, %v4372_v38 }
 0x239   : > { %v3381_v33 = vpop.eup %3380  ;;  %v2132_v30 = vadd.f32 %v2131_v50, %v2130_v32  ;;  %v2124_v46 = vadd.f32 %v2123_v34, %v4400_v5  ;;  %3394 = vrcp.f32 %v4402_v39  ;;  %v4685_v29 = vrot.slane %v4322_v56, 2 }
 0x23a   : > { %v2344_v24 = vmul.f32 %v3381_v33, %v2280_v1  ;;  %v2142_v2 = vadd.f32 %v2141_v63, %v4406_v49  ;;  %v2514_v51 = vsel %vm503_vm1, %v2452_v60, 0.0  ;;  %3396 = vpow2.f32 %v2970_v61 }
 0x23b   : > { %v2623_v52 = vadd.f32 %v4685_v29, %v4322_v56  ;;  %v2133_v53 = vrot.slane %v2132_v30, 1  ;;  %v2125_v21 = vrot.slane %v2124_v46, 2  ;;  %v2454_v48 = vmul.f32 %v3451_v12, %v2422_v58 }
 0x23c   : > { %v3383_v31 = vpop.eup %3382  ;;  %v2376_v44 = vsub.f32 2.0, %v2344_v24  ;;  %v2972_v17 = vmul.f32 -1.442695, %v1610_v18  ;;  %v4686_v38 = vrot.slane %v4319_v6, 1  ;;  %3398 = vrcp.f32 %v4420_v11 }
 0x23d   : > { %v3385_v62 = vpop.eup %3384  ;;  %v2325_v36 = vmul.f32 %v3383_v31, %v2261_v22  ;;  %v2134_v56 = vadd.f32 %v2133_v53, %v2132_v30  ;;  %v2126_v7 = vadd.f32 %v2125_v21, %v2124_v46  ;;  %v2515_v57 = vrot.slane %v2514_v51, 4 }
 0x23e   : > { %v4434_v1 = vadd.f32 %v4686_v38, %v4319_v6  ;;  %v3387_v20 = vpop.eup %3386  ;;  %v2408_v32 = vmul.f32 %v3381_v33, %v2376_v44  ;;  %v2143_v15 = vrot.slane %v2142_v2, 2  ;;  %v2624_v61 = vrot.slane %v2623_v52, 1  ;;  %v3452_v44 = vld [vmem:[%s3578_s14 + $0x30] sm:$0xff] }
 0x23f   : > { %v3389_v9 = vpop.eup %3388  ;;  %v2357_v60 = vsub.f32 2.0, %v2325_v36  ;;  %v2327_v50 = vmul.f32 %v3387_v20, %v2263_v27  ;;  %v4437_v34 = vadd.f32 1e-08, %v2134_v56  ;;  %v2127_v58 = vrot.slane %v2126_v7, 1  ;;  %v3453_v36 = vld [vmem:[%s3578_s14 + $0xc8] sm:$0xff] }
 0x240   : > { %v3391_v63 = vpop.eup %3390  ;;  %v2343_v6 = vmul.f32 %v3389_v9, %v2279_v16  ;;  %v4440_v18 = vmul.f32 %v3385_v62, %v4078_v23  ;;  %3400 = vpow2.f32 %v2971_v4  ;;  %v2736_v22 = vsel %vm2735_vm3, %v4326_v55, %v4317_v43 }
 0x241   : > { %v2528_v33 = vsel %vm503_vm1, %v2454_v48, 0.0  ;;  %v2389_v30 = vmul.f32 %v3383_v31, %v2357_v60  ;;  %v2359_v46 = vsub.f32 2.0, %v2327_v50  ;;  %v3393_v27 = vpop.eup %3392  ;;  %v2516_v24 = vadd.f32 %v2515_v57, %v2514_v51 }
 0x242   : > { %v2440_v29 = vmul.f32 %v2408_v32, %v4329_v19  ;;  %v2128_v53 = vadd.f32 %v2127_v58, %v2126_v7  ;;  %v2144_v16 = vadd.f32 %v2143_v15, %v2142_v2  ;;  %v2375_v4 = vsub.f32 2.0, %v2343_v6 }
 0x243   : > { %v2421_v23 = vmul.f32 %v2389_v30, %v4347_v42  ;;  %3402 = vrcp.f32 %v4437_v34  ;;  %v4449_v21 = vadd.f32 %v2624_v61, %v2623_v52  ;;  %v3395_v43 = vpop.eup %3394  ;;  %v2529_v55 = vrot.slane %v2528_v33, 4  ;;  %v3454_v30 = vld [vmem:[%s3578_s14 + $0x40] sm:$0xff] }
 0x244   : > { %v2391_v31 = vmul.f32 %v3387_v20, %v2359_v46  ;;  %v4451_v12 = vadd.f32 1e-08, %v2128_v53  ;;  %v2135_v48 = vrot.slane %v4440_v18, 4  ;;  %v3397_v51 = vpop.eup %3396  ;;  %v2346_v2 = vmul.f32 %v3393_v27, %v4396_v14 }
 0x245   : > { %v2453_v19 = vmul.f32 %v3452_v44, %v2421_v23  ;;  %v1735_v38 = vadd.f32 1.0, %v3391_v63  ;;  %v2738_v42 = vsel %vm2737_vm4, %v4337_v40, %v2736_v22  ;;  %v2517_v62 = vrot.slane %v2516_v24, 2 }
 0x246   : > { %v2472_v52 = vmul.f32 %v3453_v36, %v2440_v29  ;;  %3404 = vrcp.f32 %v4451_v12  ;;  %v2145_v56 = vrot.slane %v2144_v16, 1  ;;  %v3399_v7 = vpop.eup %3398  ;;  %v2407_v57 = vmul.f32 %v3389_v9, %v2375_v4 }
 0x247   : > { %v2521_v20 = vsel %vm503_vm1, %v2453_v19, 0.0  ;;  %v2328_v32 = vmul.f32 %v3395_v43, %v4402_v39  ;;  %3406 = vpow2.f32 %v2972_v17  ;;  %v2530_v15 = vadd.f32 %v2529_v55, %v2528_v33 }
 0x248   : > { %v2522_v61 = vrot.slane %v2521_v20, 4  ;;  %v2423_v14 = vmul.f32 %v2391_v31, %v4361_v35  ;;  %v2136_v40 = vadd.f32 %v2135_v48, %v4440_v18  ;;  %v2378_v60 = vsub.f32 2.0, %v2346_v2  ;;  %v1960_v2 = vpop.permute.xlu0 %1959 }
 0x249   : > { %v1736_v50 = vadd.f32 1.0, %v3397_v51  ;;  %v2518_v63 = vadd.f32 %v2517_v62, %v2516_v24  ;;  %v2654_v6 = vsel %vm503_vm1, %v2472_v52, 0.0  ;;  %v2345_v9 = vmul.f32 %v3399_v7, %v4420_v11  ;;  %v3455_v51 = vld [vmem:[%s3578_s14 + $0xc0] sm:$0xff] }
 0x24a   : > { %v3401_v58 = vpop.eup %3400  ;;  %v2146_v22 = vadd.f32 %v2145_v56, %v2144_v16  ;;  %v2523_v39 = vadd.f32 %v2522_v61, %v2521_v20  ;;  %v2439_v17 = vmul.f32 %v2407_v57, %v4364_v8  ;;  %v2360_v33 = vsub.f32 2.0, %v2328_v32 }
 0x24b   : > { %3408 = vrcp.f32 %v1735_v38  ;;  %v2531_v35 = vrot.slane %v2530_v15, 2  ;;  %v2455_v46 = vmul.f32 %v3454_v30, %v2423_v14  ;;  %v2137_v29 = vrot.slane %v2136_v40, 2 }
 0x24c   : > { %v2740_v53 = vsel %vm2739_vm5, %v4333_v54, %v2738_v42  ;;  %v2655_v24 = vrot.slane %v2654_v6, 4  ;;  %v2410_v4 = vmul.f32 %v3393_v27, %v2378_v60  ;;  %v1737_v55 = vadd.f32 1.0, %v3401_v58 }
 0x24d   : > { %v3403_v23 = vpop.eup %3402  ;;  %v2742_v11 = vsel %vm2741_vm6, %v4412_v47, %v2740_v53  ;;  %v2519_v16 = vrot.slane %v2518_v63, 1  ;;  %v2377_v31 = vsub.f32 2.0, %v2345_v9  ;;  %v4472_v8 = vadd.f32 1e-08, %v2146_v22 }
 0x24e   : > { %3410 = vrcp.f32 %v1736_v50  ;;  %v2524_v48 = vrot.slane %v2523_v39, 2  ;;  %v2471_v44 = vmul.f32 %v3455_v51, %v2439_v17  ;;  %v2392_v19 = vmul.f32 %v3395_v43, %v2360_v33  ;;  %v3456_v50 = vld [vmem:[%s3578_s14 + $0xd8] sm:$0xff]  ;;  %v3457_v33 = vld [vmem:[%s3578_s14 + $0x48] sm:$0xff] }
 0x24f   : > { %v2757_v54 = vsel %vm2737_vm4, %v4343_v25, %v4350_v3  ;;  %v2532_v38 = vadd.f32 %v2531_v35, %v2530_v15  ;;  %v2535_v42 = vsel %vm503_vm1, %v2455_v46, 0.0  ;;  %v2330_v47 = vmul.f32 %v3403_v23, %v4437_v34 }
 0x250   : > { %v3405_v27 = vpop.eup %3404  ;;  %v2138_v62 = vadd.f32 %v2137_v29, %v2136_v40  ;;  %v2656_v52 = vadd.f32 %v2655_v24, %v2654_v6  ;;  %v2442_v56 = vmul.f32 %v2410_v4, %v4369_v37  ;;  %3412 = vrcp.f32 %v1737_v55 }
 0x251   : > { %v3407_v36 = vpop.eup %3406  ;;  %v2329_v20 = vmul.f32 %v3405_v27, %v4451_v12  ;;  %v2520_v43 = vadd.f32 %v2519_v16, %v2518_v63  ;;  %v2409_v57 = vmul.f32 %v3399_v7, %v2377_v31  ;;  %3414 = vrcp.f32 %v4472_v8  ;;  %v2009_v63 = vpop.permute.xlu1 %2008 }
 0x252   : > { %v4484_v25 = vmul.f32 %v4275_v59, %v1960_v2  ;;  %v2525_v3 = vadd.f32 %v2524_v48, %v2523_v39  ;;  %v2536_v32 = vrot.slane %v2535_v42, 4  ;;  %v2647_v34 = vsel %vm503_vm1, %v2471_v44, 0.0  ;;  %v3458_v44 = vld [vmem:[%s3578_s14 + $0xd0] sm:$0xff] }
 0x253   : > { %v2424_v15 = vmul.f32 %v2392_v19, %v4376_v28  ;;  %v2362_v61 = vsub.f32 2.0, %v2330_v47  ;;  %v2139_v14 = vrot.slane %v2138_v62, 1  ;;  %v1738_v37 = vadd.f32 1.0, %v3407_v36 }
 0x254   : > { %v2758_v12 = vsel %vm2739_vm5, %v4434_v1, %v2757_v54  ;;  %v2533_v7 = vrot.slane %v2532_v38, 1  ;;  %v2657_v60 = vrot.slane %v2656_v52, 2  ;;  %v2474_v58 = vmul.f32 %v3456_v50, %v2442_v56 }
 0x255   : > { %v3409_v40 = vpop.eup %3408  ;;  %v2361_v59 = vsub.f32 2.0, %v2329_v20  ;;  %v2648_v6 = vrot.slane %v2647_v34, 4  ;;  %v2140_v9 = vadd.f32 %v2139_v14, %v2138_v62  ;;  %v4493_v22 = vsel %vm2741_vm6, %v4449_v21, %v2758_v12  ;;  %v1967_v2 = vpop.permute.xlu1 %1966  ;;  %v3460_v12 = vld [vmem:[%s3578_s14 + $0x50] sm:$0xff] }
 0x256   : > { %v2189_v28 = vrot.slane %v4484_v25, 4  ;;  %v2526_v39 = vrot.slane %v2525_v3, 1  ;;  %v2537_v17 = vadd.f32 %v2536_v32, %v2535_v42  ;;  %v2456_v35 = vmul.f32 %v3457_v33, %v2424_v15 }
 0x257   : > { %v2441_v1 = vmul.f32 %v2409_v57, %v4381_v13  ;;  %v2394_v46 = vmul.f32 %v3403_v23, %v2362_v61  ;;  %v4500_v29 = vadd.f32 1e-08, %v2140_v9  ;;  %v4503_v24 = vmul.f32 %v3409_v40, %v2009_v63  ;;  %v3459_v61 = vld [vmem:[%s3578_s14 + $0x58] sm:$0xff] }
 0x258   : > { %v4498_v30 = vpop.eup %3410  ;;  %v2190_v53 = vadd.f32 %v2189_v28, %v4484_v25  ;;  %v2534_v21 = vadd.f32 %v2533_v7, %v2532_v38  ;;  %v4505_v4 = vadd.f32 %v2657_v60, %v2656_v52  ;;  %v2393_v55 = vmul.f32 %v3405_v27, %v2361_v59 }
 0x259   : > { %v2744_v16 = vsel %vm2743_vm7, %v2520_v43, %v2742_v11  ;;  %v2649_v31 = vadd.f32 %v2648_v6, %v2647_v34  ;;  %v2668_v48 = vsel %vm503_vm1, %v2474_v58, 0.0  ;;  %3416 = vrcp.f32 %v4500_v29  ;;  %v1974_v50 = vpop.permute.xlu1 %1973 }
 0x25a   : > { %v2191_v13 = vrot.slane %v2190_v53, 2  ;;  %v4510_v51 = vpop.eup %3412  ;;  %v2527_v23 = vadd.f32 %v2526_v39, %v2525_v3  ;;  %v2473_v19 = vmul.f32 %v3458_v44, %v2441_v1  ;;  %3418 = vrcp.f32 %v1738_v37  ;;  %v1918_v3 = vpop.permute.xlu0 %1917 }
 0x25b   : > { %v2231_v54 = vrot.slane %v4503_v24, 4  ;;  %v3415_v38 = vpop.eup %3414  ;;  %v2538_v27 = vrot.slane %v2537_v17, 2  ;;  %v2542_v11 = vsel %vm503_vm1, %v2456_v35, 0.0  ;;  %v2426_v42 = vmul.f32 %v2394_v46, %v4393_v26 }
 0x25c   : > { %v2192_v47 = vadd.f32 %v2191_v13, %v2190_v53  ;;  %v2659_v62 = vrot.slane %v4505_v4, 1  ;;  %v2669_v36 = vrot.slane %v2668_v48, 4  ;;  %v2425_v52 = vmul.f32 %v2393_v55, %v4400_v5 }
 0x25d   : > { %v2232_v56 = vadd.f32 %v2231_v54, %v4503_v24  ;;  %v2650_v20 = vrot.slane %v2649_v31, 2  ;;  %v2332_v43 = vmul.f32 %v3415_v38, %v4472_v8  ;;  %v2543_v26 = vrot.slane %v2542_v11, 4 }
 0x25e   : > { %v2193_v57 = vrot.slane %v2192_v47, 1  ;;  %v2661_v32 = vsel %vm503_vm1, %v2473_v19, 0.0  ;;  %v2746_v5 = vsel %vm2745_vm8, %v2527_v23, %v2744_v16  ;;  %v4528_v15 = vadd.f32 %v2538_v27, %v2537_v17  ;;  %v2016_v9 = vpop.permute.xlu0 %2015 }
 0x25f   : > { %v2233_v34 = vrot.slane %v2232_v56, 2  ;;  %v2458_v14 = vmul.f32 %v3459_v61, %v2426_v42  ;;  %v4531_v37 = vadd.f32 %v2669_v36, %v2668_v48  ;;  %v2457_v40 = vmul.f32 %v3460_v12, %v2425_v52  ;;  %v2030_v36 = vpop.permute.xlu1 %2029 }
 0x260   : > { %v2194_v8 = vadd.f32 %v2193_v57, %v2192_v47  ;;  %v2748_v60 = vsel %vm2747_vm9, %v2534_v21, %v2746_v5  ;;  %v4535_v58 = vadd.f32 %v2650_v20, %v2649_v31  ;;  %v2662_v59 = vrot.slane %v2661_v32, 4 }
 0x261   : > { %v2234_v7 = vadd.f32 %v2233_v34, %v2232_v56  ;;  %v2364_v63 = vsub.f32 2.0, %v2332_v43  ;;  %2774 = vst.msk [vmem:[%s4524_s22] sm:$0xff] %vm368_vm0, %v2748_v60  ;;  %v4539_v28 = vadd.f32 %v2543_v26, %v2542_v11  ;;  %v4542_v17 = vmul.f32 %v4247_v0, %v1918_v3 }
 0x262   : > { %v2276_v6 = vadd.f32 1e-08, %v2194_v8  ;;  %v4545_v33 = vmul.f32 %v4284_v41, %v1967_v2  ;;  %v2540_v1 = vrot.slane %v4528_v15, 1  ;;  %v2556_v46 = vsel %vm503_vm1, %v2458_v14, 0.0  ;;  %v2023_v11 = vpop.permute.xlu0 %2022  ;;  %v3461_v8 = vld [vmem:[%s3578_s14 + $0x60] sm:$0xff] }
 0x263   : > { %v2235_v39 = vrot.slane %v2234_v7, 1  ;;  %v3417_v35 = vpop.eup %3416  ;;  %v4550_v53 = vmul.f32 %v4280_v10, %v1974_v50  ;;  %v2549_v55 = vsel %vm503_vm1, %v2457_v40, 0.0  ;;  %v2153_v0 = vrot.slane %v4542_v17, 4  ;;  %v3462_v50 = vld [vmem:[%s3578_s14 + $0x68] sm:$0xff] }
 0x264   : > { %3420 = vrcp.f32 %v2276_v6  ;;  %v3419_v21 = vpop.eup %3418  ;;  %v2331_v16 = vmul.f32 %v3417_v35, %v4500_v29  ;;  %v2396_v48 = vmul.f32 %v3415_v38, %v2364_v63  ;;  %v2195_v41 = vrot.slane %v4545_v33, 4 }
 0x265   : > { %v2236_v31 = vadd.f32 %v2235_v39, %v2234_v7  ;;  %v2201_v13 = vrot.slane %v4550_v53, 4  ;;  %v4558_v23 = vmul.f32 %v4498_v30, %v2016_v9  ;;  %v2557_v44 = vrot.slane %v2556_v46, 4 }
 0x266   : > { %v2363_v19 = vsub.f32 2.0, %v2331_v16  ;;  %v2154_v54 = vadd.f32 %v2153_v0, %v4542_v17  ;;  %v2545_v2 = vrot.slane %v4539_v28, 2  ;;  %v4562_v27 = vadd.f32 %v2662_v59, %v2661_v32 }
 0x267   : > { %v2283_v10 = vadd.f32 1e-08, %v2236_v31  ;;  %v2196_v29 = vadd.f32 %v2195_v41, %v4545_v33  ;;  %v2202_v38 = vadd.f32 %v2201_v13, %v4550_v53  ;;  %v2550_v42 = vrot.slane %v2549_v55, 4 }
 0x268   : > { %v2395_v47 = vmul.f32 %v3417_v35, %v2363_v19  ;;  %v2155_v30 = vrot.slane %v2154_v54, 2  ;;  %v2428_v52 = vmul.f32 %v2396_v48, %v4406_v49  ;;  %v2237_v43 = vrot.slane %v4558_v23, 4 }
 0x269   : > { %3422 = vrcp.f32 %v2283_v10  ;;  %v2197_v56 = vrot.slane %v2196_v29, 2  ;;  %v2203_v20 = vrot.slane %v2202_v38, 2  ;;  %v4568_v57 = vadd.f32 %v2557_v44, %v2556_v46 }
 0x26a   : > { %v2427_v3 = vmul.f32 %v2395_v47, %v4440_v18  ;;  %v2156_v26 = vadd.f32 %v2155_v30, %v2154_v54  ;;  %v4572_v32 = vmul.f32 %v4510_v51, %v2023_v11  ;;  %v2238_v61 = vadd.f32 %v2237_v43, %v4558_v23 }
 0x26b   : > { %v2198_v34 = vadd.f32 %v2197_v56, %v2196_v29  ;;  %v2204_v5 = vadd.f32 %v2203_v20, %v2202_v38  ;;  %v4575_v14 = vmul.f32 %v3419_v21, %v2030_v36  ;;  %v2551_v49 = vadd.f32 %v2550_v42, %v2549_v55 }
 0x26c   : > { %v2459_v12 = vmul.f32 %v3461_v8, %v2427_v3  ;;  %v2157_v40 = vrot.slane %v2156_v26, 1  ;;  %v2243_v7 = vrot.slane %v4572_v32, 4  ;;  %v2460_v59 = vmul.f32 %v3462_v50, %v2428_v52 }
 0x26d   : > { %v2199_v18 = vrot.slane %v2198_v34, 1  ;;  %v2205_v63 = vrot.slane %v2204_v5, 1  ;;  %v2239_v9 = vrot.slane %v2238_v61, 2  ;;  %v2249_v31 = vrot.slane %v4575_v14, 4 }
 0x26e   : > { %v3421_v60 = vpop.eup %3420  ;;  %v2563_v51 = vsel %vm503_vm1, %v2459_v12, 0.0  ;;  %v2158_v35 = vadd.f32 %v2157_v40, %v2156_v26  ;;  %v2244_v46 = vadd.f32 %v2243_v7, %v4572_v32  ;;  %v2552_v44 = vrot.slane %v2551_v49, 2 }
 0x26f   : > { %v2340_v39 = vmul.f32 %v3421_v60, %v2276_v6  ;;  %v2564_v21 = vrot.slane %v2563_v51, 4  ;;  %v2200_v16 = vadd.f32 %v2199_v18, %v2198_v34  ;;  %v2206_v55 = vadd.f32 %v2205_v63, %v2204_v5 }
 0x270   : > { %v2270_v48 = vadd.f32 1e-08, %v2158_v35  ;;  %v2240_v41 = vadd.f32 %v2239_v9, %v2238_v61  ;;  %v2245_v13 = vrot.slane %v2244_v46, 2  ;;  %v2570_v19 = vsel %vm503_vm1, %v2460_v59, 0.0  ;;  %v3463_v61 = vld [vmem:[%s3578_s14 + $0xa8] sm:$0xff] }
 0x271   : > { %v2372_v0 = vsub.f32 2.0, %v2340_v39  ;;  %v2277_v54 = vadd.f32 1e-08, %v2200_v16  ;;  %v2278_v29 = vadd.f32 1e-08, %v2206_v55  ;;  %v2565_v47 = vadd.f32 %v2564_v21, %v2563_v51 }
 0x272   : > { %3424 = vrcp.f32 %v2270_v48  ;;  %v2241_v6 = vrot.slane %v2240_v41, 1  ;;  %v2246_v42 = vadd.f32 %v2245_v13, %v2244_v46  ;;  %v2250_v36 = vadd.f32 %v2249_v31, %v4575_v14  ;;  %v3464_v13 = vld [vmem:[%s3578_s14 + $0xe0] sm:$0xff] }
 0x273   : > { %v3423_v38 = vpop.eup %3422  ;;  %v2404_v11 = vmul.f32 %v3421_v60, %v2372_v0  ;;  %3426 = vrcp.f32 %v2277_v54  ;;  %v2546_v43 = vadd.f32 %v2545_v2, %v4539_v28  ;;  %v2559_v3 = vrot.slane %v4568_v57, 2 }
 0x274   : > { %v2347_v30 = vmul.f32 %v3423_v38, %v2283_v10  ;;  %3428 = vrcp.f32 %v2278_v29  ;;  %v2242_v56 = vadd.f32 %v2241_v6, %v2240_v41  ;;  %v2247_v20 = vrot.slane %v2246_v42, 1 }
 0x275   : > { %v2436_v52 = vmul.f32 %v2404_v11, %v4484_v25  ;;  %v2251_v34 = vrot.slane %v2250_v36, 2  ;;  %v2571_v5 = vrot.slane %v2570_v19, 4  ;;  %v2664_v10 = vrot.slane %v4562_v27, 2 }
 0x276   : > { %v2379_v26 = vsub.f32 2.0, %v2347_v30  ;;  %v2284_v12 = vadd.f32 1e-08, %v2242_v56  ;;  %v2248_v40 = vadd.f32 %v2247_v20, %v2246_v42  ;;  %v2553_v7 = vadd.f32 %v2552_v44, %v2551_v49 }
 0x277   : > { %v2468_v8 = vmul.f32 %v3463_v61, %v2436_v52  ;;  %v2252_v50 = vadd.f32 %v2251_v34, %v2250_v36  ;;  %v2566_v25 = vrot.slane %v2565_v47, 2  ;;  %v2547_v28 = vrot.slane %v2546_v43, 1 }
 0x278   : > { %v2411_v60 = vmul.f32 %v3423_v38, %v2379_v26  ;;  %3430 = vrcp.f32 %v2284_v12  ;;  %v4591_v18 = vadd.f32 1e-08, %v2248_v40  ;;  %v4597_v51 = vadd.f32 %v2659_v62, %v4505_v4 }
 0x279   : > { %v2626_v59 = vsel %vm503_vm1, %v2468_v8, 0.0  ;;  %v2253_v9 = vrot.slane %v2252_v50, 1  ;;  %v2560_v49 = vadd.f32 %v2559_v3, %v4568_v57  ;;  %v2572_v39 = vadd.f32 %v2571_v5, %v2570_v19 }
 0x27a   : > { %v2627_v2 = vrot.slane %v2626_v59, 4  ;;  %v2443_v63 = vmul.f32 %v2411_v60, %v4503_v24  ;;  %3432 = vrcp.f32 %v4591_v18  ;;  %v2652_v35 = vrot.slane %v4535_v58, 1 }
 0x27b   : > { %v2671_v46 = vrot.slane %v4531_v37, 2  ;;  %v2254_v16 = vadd.f32 %v2253_v9, %v2252_v50  ;;  %v2541_v24 = vadd.f32 %v2540_v1, %v4528_v15  ;;  %v4607_v4 = vadd.f32 %v2664_v10, %v4562_v27 }
 0x27c   : > { %v2628_v21 = vadd.f32 %v2627_v2, %v2626_v59  ;;  %v3425_v55 = vpop.eup %3424  ;;  %v2554_v62 = vrot.slane %v2553_v7, 1  ;;  %v2567_v31 = vadd.f32 %v2566_v25, %v2565_v47  ;;  %v2548_v0 = vadd.f32 %v2547_v28, %v2546_v43  ;;  %v3465_v2 = vld [vmem:[%s3578_s14 + $0x78] sm:$0xff] }
 0x27d   : > { %v3427_v57 = vpop.eup %3426  ;;  %v2475_v44 = vmul.f32 %v3464_v13, %v2443_v63  ;;  %v2334_v19 = vmul.f32 %v3425_v55, %v2270_v48  ;;  %v2561_v11 = vrot.slane %v2560_v49, 1  ;;  %v2573_v6 = vrot.slane %v2572_v39, 2 }
 0x27e   : > { %v2629_v41 = vrot.slane %v2628_v21, 2  ;;  %v3429_v38 = vpop.eup %3428  ;;  %v2341_v42 = vmul.f32 %v3427_v57, %v2277_v54  ;;  %v2286_v30 = vadd.f32 1e-08, %v2254_v16  ;;  %v4687_v15 = vrot.slane %v4237_v45, 2 }
 0x27f   : > { %v2366_v27 = vsub.f32 2.0, %v2334_v19  ;;  %v2342_v52 = vmul.f32 %v3429_v38, %v2278_v29  ;;  %v2555_v56 = vadd.f32 %v2554_v62, %v2553_v7  ;;  %v2568_v47 = vrot.slane %v2567_v31, 1 }
 0x280   : > { %v2630_v36 = vadd.f32 %v2629_v41, %v2628_v21  ;;  %v2581_v1 = vadd.f32 %v4687_v15, %v4237_v45  ;;  %v2373_v20 = vsub.f32 2.0, %v2341_v42  ;;  %3434 = vrcp.f32 %v2286_v30 }
 0x281   : > { %v2675_v3 = vsel %vm503_vm1, %v2475_v44, 0.0  ;;  %v2398_v48 = vmul.f32 %v3425_v55, %v2366_v27  ;;  %v2374_v26 = vsub.f32 2.0, %v2342_v52  ;;  %v2562_v54 = vadd.f32 %v2561_v11, %v2560_v49  ;;  %v3468_v27 = vld [vmem:[%s3578_s14 + $0xe8] sm:$0xff] }
 0x282   : > { %v2631_v43 = vrot.slane %v2630_v36, 1  ;;  %v3431_v34 = vpop.eup %3430  ;;  %v2574_v5 = vadd.f32 %v2573_v6, %v2572_v39  ;;  %v2749_v61 = vsel %vm2735_vm3, %v2548_v0, %v2541_v24  ;;  %v2405_v8 = vmul.f32 %v3427_v57, %v2373_v20 }
 0x283   : > { %v2430_v45 = vmul.f32 %v2398_v48, %v4542_v17  ;;  %v2406_v29 = vmul.f32 %v3429_v38, %v2374_v26  ;;  %v2348_v10 = vmul.f32 %v3431_v34, %v2284_v12  ;;  %v2569_v60 = vadd.f32 %v2568_v47, %v2567_v31  ;;  %v3466_v12 = vld [vmem:[%s3578_s14 + $0xb0] sm:$0xff] }
 0x284   : > { %v2632_v40 = vadd.f32 %v2631_v43, %v2630_v36  ;;  %v3433_v7 = vpop.eup %3432  ;;  %v2676_v50 = vrot.slane %v2675_v3, 4  ;;  %v2750_v25 = vsel %vm2737_vm4, %v2555_v56, %v2749_v61  ;;  %v2437_v59 = vmul.f32 %v2405_v8, %v4545_v33  ;;  %v3467_v33 = vld [vmem:[%s3578_s14 + $0xb8] sm:$0xff] }
 0x285   : > { %v2462_v63 = vmul.f32 %v3465_v2, %v2430_v45  ;;  %v2438_v9 = vmul.f32 %v2406_v29, %v4550_v53  ;;  %v2380_v49 = vsub.f32 2.0, %v2348_v10  ;;  %v2575_v17 = vrot.slane %v2574_v5, 1 }
 0x286   : > { %v4620_v28 = vsel %vm2743_vm7, %v2632_v40, %v4493_v22  ;;  %v2582_v39 = vrot.slane %v2581_v1, 1  ;;  %v2469_v21 = vmul.f32 %v3466_v12, %v2437_v59  ;;  %v2349_v16 = vmul.f32 %v3433_v7, %v4591_v18 }
 0x287   : > { %v2751_v55 = vsel %vm2739_vm5, %v2562_v54, %v2750_v25  ;;  %v2584_v24 = vsel %vm503_vm1, %v2462_v63, 0.0  ;;  %v2470_v62 = vmul.f32 %v3467_v33, %v2438_v9  ;;  %v2412_v31 = vmul.f32 %v3431_v34, %v2380_v49 }
 0x288   : > { %v2752_v22 = vsel %vm2741_vm6, %v2569_v60, %v2751_v55  ;;  %v2585_v57 = vrot.slane %v2584_v24, 4  ;;  %v2633_v53 = vsel %vm503_vm1, %v2469_v21, 0.0  ;;  %v2381_v0 = vsub.f32 2.0, %v2349_v16  ;;  %v3470_v16 = vld [vmem:[%s3578_s14 + $0xf8] sm:$0xff] }
 0x289   : > { %v2677_v41 = vadd.f32 %v2676_v50, %v2675_v3  ;;  %v2634_v13 = vrot.slane %v2633_v53, 4  ;;  %v2640_v44 = vsel %vm503_vm1, %v2470_v62, 0.0  ;;  %v2444_v18 = vmul.f32 %v2412_v31, %v4558_v23 }
 0x28a   : > { %v3435_v19 = vpop.eup %3434  ;;  %v2576_v38 = vadd.f32 %v2575_v17, %v2574_v5  ;;  %v2586_v11 = vadd.f32 %v2585_v57, %v2584_v24  ;;  %v2641_v6 = vrot.slane %v2640_v44, 4  ;;  %v2413_v42 = vmul.f32 %v3433_v7, %v2381_v0 }
 0x28b   : > { %v2583_v36 = vadd.f32 %v2582_v39, %v2581_v1  ;;  %v2635_v15 = vadd.f32 %v2634_v13, %v2633_v53  ;;  %v2476_v52 = vmul.f32 %v3468_v27, %v2444_v18  ;;  %v2350_v56 = vmul.f32 %v3435_v19, %v2286_v30  ;;  %v3469_v1 = vld [vmem:[%s3578_s14 + $0xf0] sm:$0xff] }
 0x28c   : > { %v2753_v47 = vsel %vm2743_vm7, %v2576_v38, %v2752_v22  ;;  %v2587_v20 = vrot.slane %v2586_v11, 2  ;;  %v2642_v43 = vadd.f32 %v2641_v6, %v2640_v44  ;;  %v2445_v3 = vmul.f32 %v2413_v42, %v4572_v32 }
 0x28d   : > { %v2678_v48 = vrot.slane %v2677_v41, 2  ;;  %v2636_v26 = vrot.slane %v2635_v15, 2  ;;  %v2682_v23 = vsel %vm503_vm1, %v2476_v52, 0.0  ;;  %v2382_v34 = vsub.f32 2.0, %v2350_v56 }
 0x28e   : > { %v2588_v54 = vadd.f32 %v2587_v20, %v2586_v11  ;;  %v2643_v5 = vrot.slane %v2642_v43, 2  ;;  %v2683_v61 = vrot.slane %v2682_v23, 4  ;;  %v2477_v8 = vmul.f32 %v3469_v1, %v2445_v3 }
 0x28f   : > { %v2666_v40 = vrot.slane %v4607_v4, 1  ;;  %v2754_v30 = vsel %vm2745_vm8, %v2583_v36, %v2753_v47  ;;  %v2637_v45 = vadd.f32 %v2636_v26, %v2635_v15  ;;  %v2414_v29 = vmul.f32 %v3435_v19, %v2382_v34 }
 0x290   : > { %v2589_v10 = vrot.slane %v2588_v54, 1  ;;  %v2644_v7 = vadd.f32 %v2643_v5, %v2642_v43  ;;  %v2684_v32 = vadd.f32 %v2683_v61, %v2682_v23  ;;  %v2689_v60 = vsel %vm503_vm1, %v2477_v8, 0.0 }
 0x291   : > { %v2679_v50 = vadd.f32 %v2678_v48, %v2677_v41  ;;  %v2638_v25 = vrot.slane %v2637_v45, 1  ;;  %v2690_v59 = vrot.slane %v2689_v60, 4  ;;  %v2446_v2 = vmul.f32 %v2414_v29, %v4575_v14 }
 0x292   : > { %v2672_v63 = vadd.f32 %v2671_v46, %v4531_v37  ;;  %v2590_v9 = vadd.f32 %v2589_v10, %v2588_v54  ;;  %v2645_v49 = vrot.slane %v2644_v7, 1  ;;  %v2685_v17 = vrot.slane %v2684_v32, 2 }
 0x293   : > { %v2653_v39 = vadd.f32 %v2652_v35, %v4535_v58  ;;  %v2639_v12 = vadd.f32 %v2638_v25, %v2637_v45  ;;  %v2691_v21 = vadd.f32 %v2690_v59, %v2689_v60  ;;  %v2478_v55 = vmul.f32 %v3470_v16, %v2446_v2 }
 0x294   : > { %v2667_v24 = vadd.f32 %v2666_v40, %v4607_v4  ;;  %v2755_v14 = vsel %vm2747_vm9, %v2590_v9, %v2754_v30  ;;  %v2646_v33 = vadd.f32 %v2645_v49, %v2644_v7  ;;  %v2686_v62 = vadd.f32 %v2685_v17, %v2684_v32 }
 0x295   : > { %v2680_v31 = vrot.slane %v2679_v50, 1  ;;  %2775 = vst.msk [vmem:[%s4524_s22 + $0x8] sm:$0xff] %vm368_vm0, %v2755_v14  ;;  %v2761_v37 = vsel %vm2745_vm8, %v2639_v12, %v4620_v28  ;;  %v2692_v46 = vrot.slane %v2691_v21, 2  ;;  %v2696_v58 = vsel %vm503_vm1, %v2478_v55, 0.0 }
 0x296   : > { %v2673_v35 = vrot.slane %v2672_v63, 1  ;;  %v2762_v22 = vsel %vm2747_vm9, %v2646_v33, %v2761_v37  ;;  %v2687_v57 = vrot.slane %v2686_v62, 1  ;;  %v2697_v53 = vrot.slane %v2696_v58, 4 }
 0x297   : > { %2776 = vst.msk [vmem:[%s4524_s22 + $0x10] sm:$0xff] %vm368_vm0, %v2762_v22  ;;  %v2693_v4 = vadd.f32 %v2692_v46, %v2691_v21  ;;  %v2763_v0 = vsel %vm2735_vm3, %v4597_v51, %v2653_v39  ;;  %v2681_v13 = vadd.f32 %v2680_v31, %v2679_v50 }
 0x298   : > { %v2698_v41 = vadd.f32 %v2697_v53, %v2696_v58  ;;  %v2764_v44 = vsel %vm2737_vm4, %v2667_v24, %v2763_v0  ;;  %v2674_v18 = vadd.f32 %v2673_v35, %v2672_v63  ;;  %v2688_v19 = vadd.f32 %v2687_v57, %v2686_v62 }
 0x299   : > { %v2694_v28 = vrot.slane %v2693_v4, 1 }
 0x29a   : > { %v2699_v38 = vrot.slane %v2698_v41, 2  ;;  %v2765_v6 = vsel %vm2739_vm5, %v2674_v18, %v2764_v44 }
 0x29b   : > { %v2695_v11 = vadd.f32 %v2694_v28, %v2693_v4  ;;  %v2766_v36 = vsel %vm2741_vm6, %v2681_v13, %v2765_v6 }
 0x29c   : > { %v2700_v42 = vadd.f32 %v2699_v38, %v2698_v41  ;;  %v2767_v15 = vsel %vm2743_vm7, %v2688_v19, %v2766_v36 }
 0x29d   : > { %v2768_v51 = vsel %vm2745_vm8, %v2695_v11, %v2767_v15 }
 0x29e   : > { %v2701_v27 = vrot.slane %v2700_v42, 1 }
 0x2a0   : > { %v2702_v52 = vadd.f32 %v2701_v27, %v2700_v42 }
 0x2a2   : > { %v2769_v56 = vsel %vm2747_vm9, %v2702_v52, %v2768_v51 }
 0x2a3   : > { %2777 = vst.msk [vmem:[%s4524_s22 + $0x18] sm:$0xff] %vm368_vm0, %v2769_v56 }
 0x2a4 PF: > { %s19_s29 = sadd.s32 1, %s3477_s29  }
 0x2a5   : > { %p16_p5 = scmp.ge.s32.totalorder %s19_s29, 4  }
 0x2a7   :  { %18 = sbr.rel (!%p16_p5) target bundleno = 2 (0x2), region = 88 }

</bundles_post_ra>
